<compile_context>
chip_gen: v7x
topology: tpu7x:2x2x1
jax: 0.10.0
libtpu: 0.0.40
codegen_flags: <defaults>
</compile_context>

<pallas_src>
import functools

import numpy as np

import jax
import jax.numpy as jnp
from jax.experimental import pallas as pl
from jax.experimental.pallas import tpu as pltpu


def bottleneck_kernel(x_ref, s1_ref, b1_ref, w1t_ref, b2_ref, w2o_ref,
                      w2c_ref, mask_ref, out_ref, col_ref, *, W, IC):
    # x_ref: (C, NHW) f32 with NHW = (images per block) * H * W on lanes.
    x = x_ref[...]
    nhw = x.shape[1]

    # ---- BN1 + ReLU (f32 VPU, lane-dense) ---------------------------------
    h1 = jnp.maximum(x * s1_ref[...] + b1_ref[...], 0.0)          # (C, NHW)

    # ---- 1x1 conv (BN2 scale pre-folded into w1 in the wrapper) -----------
    # NOTE: at tiny C this matmul is MXU-idle (K=C); could be C VPU FMAs, but
    # the MXU path is kept so it scales as C grows across the dense block.
    q = jnp.dot(w1t_ref[...], h1.astype(jnp.bfloat16),
                preferred_element_type=jnp.float32)               # (IC, NHW)

    # ---- BN2 shift + ReLU ---------------------------------------------------
    p = jnp.maximum(q + b2_ref[...], 0.0)                         # (IC, NHW)

    # ---- 3x3 conv, padding=1 ------------------------------------------------
    # 8 off-center taps: lane-roll + precomputed boundary mask, written into a
    # bf16 VMEM scratch (rows [t*IC:(t+1)*IC]).  Masks guarantee no wrap /
    # cross-image contamination when the batch is fused onto the lane axis.
    masks = mask_ref[...]                                          # (8, NHW)
    t = 0
    for dy in range(3):
        for dx in range(3):
            if dy == 1 and dx == 1:
                continue                                           # center tap
            off = (dy - 1) * W + (dx - 1)
            shifted = pltpu.roll(p, shift=(-off) % nhw, axis=1)    # XLU
            tap = shifted * masks[t:t + 1, :]                      # f32 VPU
            col_ref[t * IC:(t + 1) * IC, :] = tap.astype(jnp.bfloat16)
            t += 1

    # K = 8*IC = 256: exactly one MXU K-pass on v6e/v7x.
    out = jnp.dot(w2o_ref[...], col_ref[...],
                  preferred_element_type=jnp.float32)              # (OC, NHW)
    # Center tap: no roll, no mask.
    out = out + jnp.dot(w2c_ref[...], p.astype(jnp.bfloat16),
                        preferred_element_type=jnp.float32)
    out_ref[...] = out.astype(out_ref.dtype)


def _default_grid_blocks(n):
    """2-way parallel grid on dual-TensorCore chips (v7x), else 1 step."""
    try:
        kind = jax.devices()[0].device_kind.lower()
    except Exception:  # pragma: no cover - defensive
        return 1
    if "v7" in kind and n >= 2 and n % 2 == 0:
        return 2
    return 1


def bottleneck_block(x, params, *, grid_blocks=None):
    """x: (N, C, H, W) float32 (PyTorch NCHW).

    Returns (N, C + out_channels, H, W) = concat([x, block_out], channel).
    """
    N, C, H, W = x.shape
    HW = H * W

    w1 = params["w1"]                    # (IC, C, 1, 1)  PyTorch OIHW
    w2 = params["w2"]                    # (OC, IC, 3, 3) PyTorch OIHW
    IC = w1.shape[0]
    OC = w2.shape[0]

    if grid_blocks is None:
        grid_blocks = _default_grid_blocks(N)
    assert N % grid_blocks == 0, (N, grid_blocks)
    nb = N // grid_blocks                 # images per grid step
    block_nhw = nb * HW

    # ---- layout plumbing (cheap XLA ops in the wrapper) ---------------------
    # (N, C, H, W) -> (C, N*HW): channels on sublanes, batch*spatial on lanes.
    x2 = jnp.transpose(x, (1, 0, 2, 3)).reshape(C, N * HW)

    s1 = params["s1"].reshape(C, 1).astype(jnp.float32)
    b1 = params["b1"].reshape(C, 1).astype(jnp.float32)
    s2 = params["s2"].astype(jnp.float32)
    b2 = params["b2"].reshape(IC, 1).astype(jnp.float32)

    # Fold BN2 scale into the 1x1 conv weight; cast matmul weights to bf16.
    w1t = (w1.reshape(IC, C).astype(jnp.float32) * s2[:, None]
           ).astype(jnp.bfloat16)                                  # (IC, C)
    w2taps = jnp.transpose(w2, (0, 2, 3, 1)).reshape(OC, 9, IC)    # tap-major
    off_idx = np.array([0, 1, 2, 3, 5, 6, 7, 8])                   # skip center
    w2_off = w2taps[:, off_idx, :].reshape(OC, 8 * IC).astype(jnp.bfloat16)
    w2_ctr = w2taps[:, 4, :].astype(jnp.bfloat16)                  # (OC, IC)

    # Precomputed boundary masks for the 8 off-center taps: (8, block_nhw).
    yy, xx = np.meshgrid(np.arange(H), np.arange(W), indexing="ij")
    m = []
    for dy in range(3):
        for dx in range(3):
            if dy == 1 and dx == 1:
                continue
            valid = ((yy + dy - 1 >= 0) & (yy + dy - 1 < H) &
                     (xx + dx - 1 >= 0) & (xx + dx - 1 < W))
            m.append(valid.reshape(-1))
    mask8 = np.tile(np.stack(m, 0).astype(np.float32), (1, nb))    # per-image
    mask8 = jnp.asarray(mask8)

    kernel = functools.partial(bottleneck_kernel, W=W, IC=IC)

    flops = 2 * N * HW * (C * IC + 9 * IC * OC)
    bytes_accessed = (4 * N * HW * (C + OC)            # x in, out
                      + 2 * (IC * C + 9 * IC * OC)     # bf16 weights
                      + 4 * (2 * C + IC + 8 * block_nhw))

    out = pl.pallas_call(
        kernel,
        out_shape=jax.ShapeDtypeStruct((OC, N * HW), x.dtype),
        grid_spec=pltpu.PrefetchScalarGridSpec(
            num_scalar_prefetch=0,
            grid=(grid_blocks,),
            in_specs=[
                pl.BlockSpec((C, block_nhw), lambda g: (0, g)),
                pl.BlockSpec((C, 1), lambda g: (0, 0)),
                pl.BlockSpec((C, 1), lambda g: (0, 0)),
                pl.BlockSpec((IC, C), lambda g: (0, 0)),
                pl.BlockSpec((IC, 1), lambda g: (0, 0)),
                pl.BlockSpec((OC, 8 * IC), lambda g: (0, 0)),
                pl.BlockSpec((OC, IC), lambda g: (0, 0)),
                pl.BlockSpec((8, block_nhw), lambda g: (0, 0)),
            ],
            out_specs=pl.BlockSpec((OC, block_nhw), lambda g: (0, g)),
            scratch_shapes=[pltpu.VMEM((8 * IC, block_nhw), jnp.bfloat16)],
        ),
        compiler_params=pltpu.CompilerParams(
            dimension_semantics=("parallel",),
            vmem_limit_bytes=32 * 1024 * 1024),   # headroom for larger shapes
        cost_estimate=pl.CostEstimate(
            flops=int(flops), transcendentals=0,
            bytes_accessed=int(bytes_accessed)),
    )(x2, s1, b1, w1t, b2, w2_off, w2_ctr, mask8)

    # (OC, N*HW) -> (N, OC, H, W); DenseNet concat done outside the kernel.
    out = jnp.transpose(out.reshape(OC, N, H, W), (1, 0, 2, 3))
    return jnp.concatenate([x, out], axis=1)


def make_params(key, channels, out_channels, growth_rate=8, bn_size=4,
                eps=1e-5):
    inter_channels = bn_size * growth_rate
    ks = jax.random.split(key, 10)

    # BN1 params (inference: fold to scale/shift)
    g1 = 1.0 + 0.1 * jax.random.normal(ks[0], (channels,), jnp.float32)
    be1 = 0.1 * jax.random.normal(ks[1], (channels,), jnp.float32)
    m1 = 0.1 * jax.random.normal(ks[2], (channels,), jnp.float32)
    v1 = jnp.abs(jax.random.normal(ks[3], (channels,), jnp.float32)) + 0.5
    s1 = g1 / jnp.sqrt(v1 + eps)
    b1 = be1 - m1 * s1

    # conv1: PyTorch OIHW (inter, channels, 1, 1)
    w1 = 0.1 * jax.random.normal(ks[4], (inter_channels, channels, 1, 1),
                                 jnp.float32)

    # BN2 params
    g2 = 1.0 + 0.1 * jax.random.normal(ks[5], (inter_channels,), jnp.float32)
    be2 = 0.1 * jax.random.normal(ks[6], (inter_channels,), jnp.float32)
    m2 = 0.1 * jax.random.normal(ks[7], (inter_channels,), jnp.float32)
    v2 = jnp.abs(jax.random.normal(ks[8], (inter_channels,),
                                   jnp.float32)) + 0.5
    s2 = g2 / jnp.sqrt(v2 + eps)
    b2 = be2 - m2 * s2

    # conv2: PyTorch OIHW (out, inter, 3, 3)
    w2 = 0.1 * jax.random.normal(ks[9], (out_channels, inter_channels, 3, 3),
                                 jnp.float32)

    return {"s1": s1, "b1": b1, "w1": w1, "s2": s2, "b2": b2, "w2": w2}


def reference(x, params):
    """Pure-JAX f32 reference of the same forward (NCHW, matches PyTorch)."""
    s1 = params["s1"].reshape(1, -1, 1, 1)
    b1 = params["b1"].reshape(1, -1, 1, 1)
    s2 = params["s2"].reshape(1, -1, 1, 1)
    b2 = params["b2"].reshape(1, -1, 1, 1)

    h = jnp.maximum(x * s1 + b1, 0.0)
    q = jax.lax.conv_general_dilated(
        h, params["w1"], window_strides=(1, 1), padding="VALID",
        dimension_numbers=("NCHW", "OIHW", "NCHW"))
    p = jnp.maximum(q * s2 + b2, 0.0)
    out = jax.lax.conv_general_dilated(
        p, params["w2"], window_strides=(1, 1), padding=((1, 1), (1, 1)),
        dimension_numbers=("NCHW", "OIHW", "NCHW"))
    return jnp.concatenate([x, out], axis=1)


if __name__ == "__main__":
    key = jax.random.PRNGKey(0)
    kx, kp = jax.random.split(key)

    N, C, H, W = 2, 4, 16, 16          # PyTorch input: (2, 4, 16, 16)
    growth_rate, bn_size = 8, 4
    out_channels = growth_rate          # DenseNet: block emits growth_rate ch.

    x = jax.random.normal(kx, (N, C, H, W), jnp.float32)
    params = make_params(kp, C, out_channels, growth_rate, bn_size)

    y = bottleneck_block(x, params)
    y = jax.block_until_ready(y)

    y_ref = reference(x, params)
    assert y.shape == (N, C + out_channels, H, W), y.shape
    # bf16 matmul operands (f32 accumulation) -> slightly looser tolerance
    # than a pure-f32 comparison.
    err = float(jnp.max(jnp.abs(y - y_ref)))
    assert jnp.allclose(y, y_ref, atol=3e-2, rtol=3e-2), err

    print("KERNEL_OK")
</pallas_src>

<mosaic_0001>
module attributes {stable_mosaic.version = 11 : i64} {
  func.func @bottleneck_kernel(%arg0: i32, %arg1: memref<4x512xf32, #tpu.memory_space<vmem>>, %arg2: memref<4x1xf32, #tpu.memory_space<vmem>>, %arg3: memref<4x1xf32, #tpu.memory_space<vmem>>, %arg4: memref<32x4xbf16, #tpu.memory_space<vmem>>, %arg5: memref<32x1xf32, #tpu.memory_space<vmem>>, %arg6: memref<8x256xbf16, #tpu.memory_space<vmem>>, %arg7: memref<8x32xbf16, #tpu.memory_space<vmem>>, %arg8: memref<8x512xf32, #tpu.memory_space<vmem>>, %arg9: memref<8x512xf32, #tpu.memory_space<vmem>>, %arg10: memref<256x512xbf16, #tpu.memory_space<vmem>>) attributes {dimension_semantics = [#tpu.dimension_semantics<parallel>], iteration_bounds = array<i64: 1>, scalar_prefetch = 0 : i64, scratch_operands = 1 : i64, tpu.core_type = #tpu.core_type<tc>, window_params = [{transform_indices = @transform_0, window_bounds = array<i64: 4, 512>}, {pipeline_mode = #tpu.pipeline_mode<synchronous>, transform_indices = @transform_1, window_bounds = array<i64: 4, 1>}, {pipeline_mode = #tpu.pipeline_mode<synchronous>, transform_indices = @transform_2, window_bounds = array<i64: 4, 1>}, {pipeline_mode = #tpu.pipeline_mode<synchronous>, transform_indices = @transform_3, window_bounds = array<i64: 32, 4>}, {pipeline_mode = #tpu.pipeline_mode<synchronous>, transform_indices = @transform_4, window_bounds = array<i64: 32, 1>}, {pipeline_mode = #tpu.pipeline_mode<synchronous>, transform_indices = @transform_5, window_bounds = array<i64: 8, 256>}, {pipeline_mode = #tpu.pipeline_mode<synchronous>, transform_indices = @transform_6, window_bounds = array<i64: 8, 32>}, {pipeline_mode = #tpu.pipeline_mode<synchronous>, transform_indices = @transform_7, window_bounds = array<i64: 8, 512>}, {transform_indices = @transform_8, window_bounds = array<i64: 8, 512>}]} {
    %c0 = arith.constant 0 : index
    %c0_0 = arith.constant 0 : index
    %0 = vector.load %arg1[%c0, %c0_0] : memref<4x512xf32, #tpu.memory_space<vmem>>, vector<4x512xf32>
    %c0_1 = arith.constant 0 : index
    %c0_2 = arith.constant 0 : index
    %1 = vector.load %arg2[%c0_1, %c0_2] : memref<4x1xf32, #tpu.memory_space<vmem>>, vector<4x1xf32>
    %2 = vector.broadcast %1 : vector<4x1xf32> to vector<4x512xf32>
    %3 = arith.mulf %0, %2 : vector<4x512xf32>
    %c0_3 = arith.constant 0 : index
    %c0_4 = arith.constant 0 : index
    %4 = vector.load %arg3[%c0_3, %c0_4] : memref<4x1xf32, #tpu.memory_space<vmem>>, vector<4x1xf32>
    %5 = vector.broadcast %4 : vector<4x1xf32> to vector<4x512xf32>
    %6 = arith.addf %3, %5 : vector<4x512xf32>
    %cst = arith.constant 0.000000e+00 : f32
    %7 = vector.broadcast %cst : f32 to vector<4x512xf32>
    %8 = arith.maximumf %6, %7 : vector<4x512xf32>
    %c0_5 = arith.constant 0 : index
    %c0_6 = arith.constant 0 : index
    %9 = vector.load %arg4[%c0_5, %c0_6] : memref<32x4xbf16, #tpu.memory_space<vmem>>, vector<32x4xbf16>
    %10 = arith.truncf %8 : vector<4x512xf32> to vector<4x512xbf16>
    %cst_7 = arith.constant dense<0.000000e+00> : vector<32x512xf32>
    %11 = tpu.matmul %9, %10, %cst_7 {dimension_numbers = #tpu.dot_dimension_numbers<[1], [0], [0], [1], [0, 0, 1, 1], [], []>} : vector<32x4xbf16>, vector<4x512xbf16>, vector<32x512xf32> -> vector<32x512xf32>
    %c0_8 = arith.constant 0 : index
    %c0_9 = arith.constant 0 : index
    %12 = vector.load %arg5[%c0_8, %c0_9] : memref<32x1xf32, #tpu.memory_space<vmem>>, vector<32x1xf32>
    %13 = vector.broadcast %12 : vector<32x1xf32> to vector<32x512xf32>
    %14 = arith.addf %11, %13 : vector<32x512xf32>
    %cst_10 = arith.constant 0.000000e+00 : f32
    %15 = vector.broadcast %cst_10 : f32 to vector<32x512xf32>
    %16 = arith.maximumf %14, %15 : vector<32x512xf32>
    %c0_11 = arith.constant 0 : index
    %c0_12 = arith.constant 0 : index
    %17 = vector.load %arg8[%c0_11, %c0_12] : memref<8x512xf32, #tpu.memory_space<vmem>>, vector<8x512xf32>
    %c17_i32 = arith.constant 17 : i32
    %18 = tpu.dynamic_rotate %16 by %c17_i32 dim 1 : vector<32x512xf32>, i32 -> vector<32x512xf32>
    %19 = vector.extract_strided_slice %17 {offsets = [0, 0], sizes = [1, 512], strides = [1, 1]} : vector<8x512xf32> to vector<1x512xf32>
    %20 = vector.broadcast %19 : vector<1x512xf32> to vector<32x512xf32>
    %21 = arith.mulf %18, %20 : vector<32x512xf32>
    %22 = arith.truncf %21 : vector<32x512xf32> to vector<32x512xbf16>
    %c0_13 = arith.constant 0 : index
    %c0_14 = arith.constant 0 : index
    %23 = vector.load %arg10[%c0_13, %c0_14] : memref<256x512xbf16, #tpu.memory_space<vmem>>, vector<32x512xbf16>
    tpu.vector_store %arg10[%c0_13, %c0_14], %22 {strides = array<i32>} : memref<256x512xbf16, #tpu.memory_space<vmem>>, vector<32x512xbf16>,
    %c16_i32 = arith.constant 16 : i32
    %24 = tpu.dynamic_rotate %16 by %c16_i32 dim 1 : vector<32x512xf32>, i32 -> vector<32x512xf32>
    %25 = vector.extract_strided_slice %17 {offsets = [1, 0], sizes = [1, 512], strides = [1, 1]} : vector<8x512xf32> to vector<1x512xf32>
    %26 = vector.broadcast %25 : vector<1x512xf32> to vector<32x512xf32>
    %27 = arith.mulf %24, %26 : vector<32x512xf32>
    %28 = arith.truncf %27 : vector<32x512xf32> to vector<32x512xbf16>
    %c32 = arith.constant 32 : index
    %c0_15 = arith.constant 0 : index
    %29 = vector.load %arg10[%c32, %c0_15] : memref<256x512xbf16, #tpu.memory_space<vmem>>, vector<32x512xbf16>
    tpu.vector_store %arg10[%c32, %c0_15], %28 {strides = array<i32>} : memref<256x512xbf16, #tpu.memory_space<vmem>>, vector<32x512xbf16>,
    %c15_i32 = arith.constant 15 : i32
    %30 = tpu.dynamic_rotate %16 by %c15_i32 dim 1 : vector<32x512xf32>, i32 -> vector<32x512xf32>
    %31 = vector.extract_strided_slice %17 {offsets = [2, 0], sizes = [1, 512], strides = [1, 1]} : vector<8x512xf32> to vector<1x512xf32>
    %32 = vector.broadcast %31 : vector<1x512xf32> to vector<32x512xf32>
    %33 = arith.mulf %30, %32 : vector<32x512xf32>
    %34 = arith.truncf %33 : vector<32x512xf32> to vector<32x512xbf16>
    %c64 = arith.constant 64 : index
    %c0_16 = arith.constant 0 : index
    %35 = vector.load %arg10[%c64, %c0_16] : memref<256x512xbf16, #tpu.memory_space<vmem>>, vector<32x512xbf16>
    tpu.vector_store %arg10[%c64, %c0_16], %34 {strides = array<i32>} : memref<256x512xbf16, #tpu.memory_space<vmem>>, vector<32x512xbf16>,
    %c1_i32 = arith.constant 1 : i32
    %36 = tpu.dynamic_rotate %16 by %c1_i32 dim 1 : vector<32x512xf32>, i32 -> vector<32x512xf32>
    %37 = vector.extract_strided_slice %17 {offsets = [3, 0], sizes = [1, 512], strides = [1, 1]} : vector<8x512xf32> to vector<1x512xf32>
    %38 = vector.broadcast %37 : vector<1x512xf32> to vector<32x512xf32>
    %39 = arith.mulf %36, %38 : vector<32x512xf32>
    %40 = arith.truncf %39 : vector<32x512xf32> to vector<32x512xbf16>
    %c96 = arith.constant 96 : index
    %c0_17 = arith.constant 0 : index
    %41 = vector.load %arg10[%c96, %c0_17] : memref<256x512xbf16, #tpu.memory_space<vmem>>, vector<32x512xbf16>
    tpu.vector_store %arg10[%c96, %c0_17], %40 {strides = array<i32>} : memref<256x512xbf16, #tpu.memory_space<vmem>>, vector<32x512xbf16>,
    %c511_i32 = arith.constant 511 : i32
    %42 = tpu.dynamic_rotate %16 by %c511_i32 dim 1 : vector<32x512xf32>, i32 -> vector<32x512xf32>
    %43 = vector.extract_strided_slice %17 {offsets = [4, 0], sizes = [1, 512], strides = [1, 1]} : vector<8x512xf32> to vector<1x512xf32>
    %44 = vector.broadcast %43 : vector<1x512xf32> to vector<32x512xf32>
    %45 = arith.mulf %42, %44 : vector<32x512xf32>
    %46 = arith.truncf %45 : vector<32x512xf32> to vector<32x512xbf16>
    %c128 = arith.constant 128 : index
    %c0_18 = arith.constant 0 : index
    %47 = vector.load %arg10[%c128, %c0_18] : memref<256x512xbf16, #tpu.memory_space<vmem>>, vector<32x512xbf16>
    tpu.vector_store %arg10[%c128, %c0_18], %46 {strides = array<i32>} : memref<256x512xbf16, #tpu.memory_space<vmem>>, vector<32x512xbf16>,
    %c497_i32 = arith.constant 497 : i32
    %48 = tpu.dynamic_rotate %16 by %c497_i32 dim 1 : vector<32x512xf32>, i32 -> vector<32x512xf32>
    %49 = vector.extract_strided_slice %17 {offsets = [5, 0], sizes = [1, 512], strides = [1, 1]} : vector<8x512xf32> to vector<1x512xf32>
    %50 = vector.broadcast %49 : vector<1x512xf32> to vector<32x512xf32>
    %51 = arith.mulf %48, %50 : vector<32x512xf32>
    %52 = arith.truncf %51 : vector<32x512xf32> to vector<32x512xbf16>
    %c160 = arith.constant 160 : index
    %c0_19 = arith.constant 0 : index
    %53 = vector.load %arg10[%c160, %c0_19] : memref<256x512xbf16, #tpu.memory_space<vmem>>, vector<32x512xbf16>
    tpu.vector_store %arg10[%c160, %c0_19], %52 {strides = array<i32>} : memref<256x512xbf16, #tpu.memory_space<vmem>>, vector<32x512xbf16>,
    %c496_i32 = arith.constant 496 : i32
    %54 = tpu.dynamic_rotate %16 by %c496_i32 dim 1 : vector<32x512xf32>, i32 -> vector<32x512xf32>
    %55 = vector.extract_strided_slice %17 {offsets = [6, 0], sizes = [1, 512], strides = [1, 1]} : vector<8x512xf32> to vector<1x512xf32>
    %56 = vector.broadcast %55 : vector<1x512xf32> to vector<32x512xf32>
    %57 = arith.mulf %54, %56 : vector<32x512xf32>
    %58 = arith.truncf %57 : vector<32x512xf32> to vector<32x512xbf16>
    %c192 = arith.constant 192 : index
    %c0_20 = arith.constant 0 : index
    %59 = vector.load %arg10[%c192, %c0_20] : memref<256x512xbf16, #tpu.memory_space<vmem>>, vector<32x512xbf16>
    tpu.vector_store %arg10[%c192, %c0_20], %58 {strides = array<i32>} : memref<256x512xbf16, #tpu.memory_space<vmem>>, vector<32x512xbf16>,
    %c495_i32 = arith.constant 495 : i32
    %60 = tpu.dynamic_rotate %16 by %c495_i32 dim 1 : vector<32x512xf32>, i32 -> vector<32x512xf32>
    %61 = vector.extract_strided_slice %17 {offsets = [7, 0], sizes = [1, 512], strides = [1, 1]} : vector<8x512xf32> to vector<1x512xf32>
    %62 = vector.broadcast %61 : vector<1x512xf32> to vector<32x512xf32>
    %63 = arith.mulf %60, %62 : vector<32x512xf32>
    %64 = arith.truncf %63 : vector<32x512xf32> to vector<32x512xbf16>
    %c224 = arith.constant 224 : index
    %c0_21 = arith.constant 0 : index
    %65 = vector.load %arg10[%c224, %c0_21] : memref<256x512xbf16, #tpu.memory_space<vmem>>, vector<32x512xbf16>
    tpu.vector_store %arg10[%c224, %c0_21], %64 {strides = array<i32>} : memref<256x512xbf16, #tpu.memory_space<vmem>>, vector<32x512xbf16>,
    %c0_22 = arith.constant 0 : index
    %c0_23 = arith.constant 0 : index
    %66 = vector.load %arg6[%c0_22, %c0_23] : memref<8x256xbf16, #tpu.memory_space<vmem>>, vector<8x256xbf16>
    %c0_24 = arith.constant 0 : index
    %c0_25 = arith.constant 0 : index
    %67 = vector.load %arg10[%c0_24, %c0_25] : memref<256x512xbf16, #tpu.memory_space<vmem>>, vector<256x512xbf16>
    %cst_26 = arith.constant dense<0.000000e+00> : vector<8x512xf32>
    %68 = tpu.matmul %66, %67, %cst_26 {dimension_numbers = #tpu.dot_dimension_numbers<[1], [0], [0], [1], [0, 0, 1, 1], [], []>} : vector<8x256xbf16>, vector<256x512xbf16>, vector<8x512xf32> -> vector<8x512xf32>
    %c0_27 = arith.constant 0 : index
    %c0_28 = arith.constant 0 : index
    %69 = vector.load %arg7[%c0_27, %c0_28] : memref<8x32xbf16, #tpu.memory_space<vmem>>, vector<8x32xbf16>
    %70 = arith.truncf %16 : vector<32x512xf32> to vector<32x512xbf16>
    %cst_29 = arith.constant dense<0.000000e+00> : vector<8x512xf32>
    %71 = tpu.matmul %69, %70, %cst_29 {dimension_numbers = #tpu.dot_dimension_numbers<[1], [0], [0], [1], [0, 0, 1, 1], [], []>} : vector<8x32xbf16>, vector<32x512xbf16>, vector<8x512xf32> -> vector<8x512xf32>
    %72 = arith.addf %68, %71 : vector<8x512xf32>
    %c0_30 = arith.constant 0 : index
    %c0_31 = arith.constant 0 : index
    %73 = vector.load %arg9[%c0_30, %c0_31] : memref<8x512xf32, #tpu.memory_space<vmem>>, vector<8x512xf32>
    tpu.vector_store %arg9[%c0_30, %c0_31], %72 {strides = array<i32>} : memref<8x512xf32, #tpu.memory_space<vmem>>, vector<8x512xf32>,
    return
  }
  func.func @transform_0(%arg0: i32) -> (i32, i32) {
    %c0_i32 = arith.constant 0 : i32
    %c0_i32_0 = arith.constant 0 : i32
    return %c0_i32, %arg0 : i32, i32
  }
  func.func @transform_1(%arg0: i32) -> (i32, i32) {
    %c0_i32 = arith.constant 0 : i32
    %c0_i32_0 = arith.constant 0 : i32
    %c0_i32_1 = arith.constant 0 : i32
    return %c0_i32, %c0_i32_0 : i32, i32
  }
  func.func @transform_2(%arg0: i32) -> (i32, i32) {
    %c0_i32 = arith.constant 0 : i32
    %c0_i32_0 = arith.constant 0 : i32
    %c0_i32_1 = arith.constant 0 : i32
    return %c0_i32, %c0_i32_0 : i32, i32
  }
  func.func @transform_3(%arg0: i32) -> (i32, i32) {
    %c0_i32 = arith.constant 0 : i32
    %c0_i32_0 = arith.constant 0 : i32
    %c0_i32_1 = arith.constant 0 : i32
    return %c0_i32, %c0_i32_0 : i32, i32
  }
  func.func @transform_4(%arg0: i32) -> (i32, i32) {
    %c0_i32 = arith.constant 0 : i32
    %c0_i32_0 = arith.constant 0 : i32
    %c0_i32_1 = arith.constant 0 : i32
    return %c0_i32, %c0_i32_0 : i32, i32
  }
  func.func @transform_5(%arg0: i32) -> (i32, i32) {
    %c0_i32 = arith.constant 0 : i32
    %c0_i32_0 = arith.constant 0 : i32
    %c0_i32_1 = arith.constant 0 : i32
    return %c0_i32, %c0_i32_0 : i32, i32
  }
  func.func @transform_6(%arg0: i32) -> (i32, i32) {
    %c0_i32 = arith.constant 0 : i32
    %c0_i32_0 = arith.constant 0 : i32
    %c0_i32_1 = arith.constant 0 : i32
    return %c0_i32, %c0_i32_0 : i32, i32
  }
  func.func @transform_7(%arg0: i32) -> (i32, i32) {
    %c0_i32 = arith.constant 0 : i32
    %c0_i32_0 = arith.constant 0 : i32
    %c0_i32_1 = arith.constant 0 : i32
    return %c0_i32, %c0_i32_0 : i32, i32
  }
  func.func @transform_8(%arg0: i32) -> (i32, i32) {
    %c0_i32 = arith.constant 0 : i32
    %c0_i32_0 = arith.constant 0 : i32
    return %c0_i32, %arg0 : i32, i32
  }
}

</mosaic_0001>

<bundles_post_ra>
// kernel: tpu_custom_call.1
= control target key start
LH: loop header
LB: loop body
LE: loop exit
PB: predicated region body
PF: predicated region fallthrough
CT: control target
= control target key end

     0   :  { %v1365_v1 = vmov 0   ;;  %s2794_s0 = inlined_call_operand.vmem [shape: f32[4,512], index: 0, kind: input, shape index: {}]   ;;  %s2795_s1 = inlined_call_operand.vmem [shape: f32[4,1], index: 1, kind: input, shape index: {}]   ;;  %s2796_s2 = inlined_call_operand.vmem [shape: f32[4,1], index: 2, kind: input, shape index: {}]   ;;  %s2797_s3 = inlined_call_operand.vmem [shape: bf16[32,4], index: 3, kind: input, shape index: {}]   ;;  %s2798_s4 = inlined_call_operand.vmem [shape: f32[32,1], index: 4, kind: input, shape index: {}]   ;;  %s2799_s5 = inlined_call_operand.vmem [shape: bf16[8,256], index: 5, kind: input, shape index: {}]   ;;  %s2800_s6 = inlined_call_operand.vmem [shape: bf16[8,32], index: 6, kind: input, shape index: {}]   ;;  %s2801_s7 = inlined_call_operand.vmem [shape: f32[8,512], index: 7, kind: input, shape index: {}]   ;;  %s2802_s8 = inlined_call_operand.hbm [shape: f32[8,512], index: 8, kind: output, shape index: {}]  }
   0x1   :  { %v33_v0 = vld [vmem:[%s2795_s1] sm:$0xf]  ;;  %1335 = vset.pattern.permute.xlu0 %v1365_v1  ;;  %165 = vmatprep.mubr.bf16.mxu0 %v1365_v1 }
   0x2   :  { %36 = vperm.xlu0 %1335, %v33_v0   ;;  %218 = vmatprep.mubr.bf16.mxu1 %v1365_v1  ;;  %v48_v2 = vld [vmem:[%s2796_s2] sm:$0xf] }
   0x3   :  { %1336 = vset.pattern.permute.xlu1 %v1365_v1 }
   0x4   :  { %13 = vsyncpa [#allocation4], 0  ;;  %v81_v3 = vld [vmem:[%s2798_s4 + $0x10] sm:$0xff]  ;;  %v79_v4 = vld [vmem:[%s2798_s4] sm:$0xff]  ;;  %v1366_v7 = vmov 839922192   ;;  %v41_v9 = vlaneseq }
   0x5   :  { %85 = vperm.xlu1 %1336, %v79_v4   ;;  %v80_v5 = vld [vmem:[%s2798_s4 + $0x8] sm:$0xff]  ;;  %v82_v6 = vld [vmem:[%s2798_s4 + $0x18] sm:$0xff]  ;;  %v39_v8 = vunpack.c.l.s4 %v1366_v7  ;;  %v31_v15 = vld [vmem:[%s2794_s0] sm:$0xff]  ;;  %vm120_vm0 = vcmask 1041408   ;;  %vm113_vm1 = vcmask 31744   ;;  %s1368_s21 = smov 16  }
   0x6   :  { %51 = vperm.xlu0 %1335, %v48_v2   ;;  %v1440_v11 = vshrl.u32 %v41_v9, 7  ;;  %v32_v16 = vld [vmem:[%s2794_s0 + $0x8] sm:$0xff]  ;;  %v1337_v33 = vld [vmem:[%s2797_s3] sm:$0xff]   ;;  %s1369_s22 = smov 15   ;;  %s1370_s23 = smov 1   ;;  %vm1111_vm2 = vcmask 261120  }
   0x7   :  { %v40_v10 = vunpack.c.0.s8 %v39_v8  ;;  %v1338_v34 = vld [vmem:[%s2797_s3 + $0x8] sm:$0xff]   ;;  %s1367_s3 = smov 17   ;;  %s1371_s24 = smov 127  }
   0x8   :  { %s1372_s25 = smov 113   ;;  %s1373_s26 = smov 112  }
   0x9   :  { %90 = vperm.xlu1 %1336, %v80_v5   ;;  %v43_v12 = vsub.s32 %v40_v10, %v1440_v11  ;;  %s1374_s27 = smov 111  }
   0xa   :  { %95 = vperm.xlu0 %1335, %v81_v3  }
   0xd   :  { %100 = vperm.xlu1 %1336, %v82_v6  }
  0x81   :  { %v37_v13 = vpop.permute.xlu0 %36 }
  0x82   :  { %v44_v14 = vrot.slane %v37_v13, %v43_v12 }
  0x84   :  { %v46_v18 = vmul.f32 %v44_v14, %v31_v15  ;;  %v47_v19 = vmul.f32 %v44_v14, %v32_v16  ;;  %v86_v35 = vpop.permute.xlu1 %85 }
  0x85   :  { %v52_v17 = vpop.permute.xlu0 %51 }
  0x86   :  { %v59_v20 = vrot.slane %v52_v17, %v43_v12 }
  0x88   :  { %v61_v21 = vadd.f32 %v59_v20, %v46_v18  ;;  %v62_v22 = vadd.f32 %v59_v20, %v47_v19  ;;  %v91_v36 = vpop.permute.xlu1 %90 }
  0x89   :  { %v96_v61 = vpop.permute.xlu0 %95 }
  0x8a   :  { %v63_v23 = vmax.f32 %v61_v21, 0.0  ;;  %v64_v24 = vmax.f32 %v62_v22, 0.0 }
  0x8c   :  { %v71_v25 = vcombine.high %v63_v23, %v63_v23  ;;  %v72_v26 = vcombine.high %v64_v24, %v64_v24  ;;  %v75_v27 = vpack.c.bf16 %v63_v23, %v63_v23  ;;  %v77_v28 = vpack.c.bf16 %v64_v24, %v64_v24  ;;  %v101_v62 = vpop.permute.xlu1 %100 }
  0x8e   :  { %v76_v29 = vpack.c.bf16 %v71_v25, %v71_v25  ;;  %v78_v30 = vpack.c.bf16 %v72_v26, %v72_v26  ;;  %v122_v31 = vsel %vm120_vm0, %v75_v27, 0  ;;  %v128_v32 = vsel %vm120_vm0, %v77_v28, 0 }
  0x90   :  { %1306 = vmatprep.subr.msk.bf16.mxu0 %vm120_vm0, %v76_v29  ;;  %1309 = vmatprep.subr.msk.bf16.mxu1 %vm120_vm0, %v78_v30 }
  0x91   :  { %134 = vmatpush1.bf16.msra.mxu0 %v122_v31  ;;  %187 = vmatpush1.bf16.msra.mxu1 %v128_v32 }
  0x94   :  { %1307 = vmatmul.mubr.msk.bf16.vlgmr.msra.gmra.mrb[0].mxu0 %vm113_vm1, %v1337_v33  ;;  %1310 = vmatmul.mubr.msk.bf16.vlgmr.msra.gmra.mrb[0].mxu1 %vm113_vm1, %v1337_v33  ;;  %v1102_v33 = vld [vmem:[%s2800_s6] sm:$0xf] }
  0x95   :  { %175 = vmatprep.mubr.bf16.mxu0 %v1365_v1  ;;  %228 = vmatprep.mubr.bf16.mxu1 %v1365_v1 }
  0x9c   :  { %1308 = vmatmul.mubr.msk.bf16.gmra.mrb[4].mxu0 %vm113_vm1, %v1338_v34  ;;  %1311 = vmatmul.mubr.msk.bf16.gmra.mrb[4].mxu1 %vm113_vm1, %v1338_v34 }
  0x9d   :  { %1147 = vmatprep.mubr.bf16.mxu0 %v1365_v1  ;;  %1188 = vmatprep.mubr.bf16.mxu1 %v1365_v1 }
 0x167   :  { %v167_v37 = vpop.f32.mrb[0].mxu0  ;;  %v220_v38 = vpop.f32.mrb[0].mxu1 }
 0x168   :  { %v168_v39 = vadd.f32 %v167_v37, %v86_v35  ;;  %v221_v40 = vadd.f32 %v220_v38, %v86_v35  ;;  %v169_v41 = vpop.f32.mrb[1].mxu0  ;;  %v222_v42 = vpop.f32.mrb[1].mxu1 }
 0x169   :  { %v170_v43 = vadd.f32 %v169_v41, %v86_v35  ;;  %v223_v44 = vadd.f32 %v222_v42, %v86_v35  ;;  %v171_v45 = vpop.f32.mrb[2].mxu0  ;;  %v224_v46 = vpop.f32.mrb[2].mxu1 }
 0x16a   :  { %v1455_v47 = vmax.f32 %v168_v39, 0.0  ;;  %v172_v48 = vadd.f32 %v171_v45, %v91_v36  ;;  %v225_v49 = vadd.f32 %v224_v46, %v91_v36  ;;  %v173_v50 = vpop.f32.mrb[3].mxu0  ;;  %v226_v51 = vpop.f32.mrb[3].mxu1  ;;  %v1457_v54 = vmax.f32 %v221_v40, 0.0 }
 0x16b   :  { %v174_v52 = vadd.f32 %v173_v50, %v91_v36  ;;  %v227_v53 = vadd.f32 %v226_v51, %v91_v36  ;;  %v1465_v57 = vmax.f32 %v170_v43, 0.0  ;;  %v1467_v58 = vmax.f32 %v223_v44, 0.0 }
 0x16c   :  { %v1459_v55 = vmax.f32 %v172_v48, 0.0  ;;  %v1461_v56 = vmax.f32 %v225_v49, 0.0  ;;  %259 = vrot.lane.b32.xlu0 %v1455_v47, %s1367_s3 }
 0x16d   :  { %v1469_v59 = vmax.f32 %v174_v52, 0.0  ;;  %v1471_v60 = vmax.f32 %v227_v53, 0.0 }
 0x16e   :  { %261 = vrot.lane.b32.xlu1 %v1459_v55, %s1367_s3  ;;  %v1105_v63 = vpack.c.bf16 %v1461_v56, %v1457_v54  ;;  %v1103_v0 = vpack.c.bf16 %v1459_v55, %v1455_v47 }
 0x16f   :  { %v177_v1 = vpop.f32.mrb[4].mxu0  ;;  %v230_v2 = vpop.f32.mrb[4].mxu1  ;;  %v1104_v3 = vpack.c.bf16 %v1469_v59, %v1465_v57  ;;  %v1106_v4 = vpack.c.bf16 %v1471_v60, %v1467_v58 }
 0x170   :  { %v179_v5 = vpop.f32.mrb[5].mxu0  ;;  %v232_v6 = vpop.f32.mrb[5].mxu1  ;;  %275 = vrot.lane.b32.xlu0 %v1457_v54, %s1367_s3  ;;  %v231_v13 = vadd.f32 %v230_v2, %v96_v61  ;;  %v178_v18 = vadd.f32 %v177_v1, %v96_v61  ;;  %v312_v2 = vsub.s32 0, %v1440_v11 }
 0x171   :  { %v180_v7 = vadd.f32 %v179_v5, %v96_v61  ;;  %v233_v8 = vadd.f32 %v232_v6, %v96_v61  ;;  %v181_v10 = vpop.f32.mrb[6].mxu0  ;;  %v234_v12 = vpop.f32.mrb[6].mxu1  ;;  %1115 = vmatprep.subr.bf16.mxu0 %v1104_v3  ;;  %1156 = vmatprep.subr.bf16.mxu1 %v1106_v4  ;;  %v1751_v3 = vld [vmem:[%s2801_s7 + $0x8] sm:$0xff] }
 0x172   :  { %v182_v14 = vadd.f32 %v181_v10, %v101_v62  ;;  %v235_v15 = vadd.f32 %v234_v12, %v101_v62  ;;  %v183_v16 = vpop.f32.mrb[7].mxu0  ;;  %v236_v17 = vpop.f32.mrb[7].mxu1  ;;  %1157 = vmatpush1.bf16.msra.mxu1 %v1105_v63  ;;  %277 = vrot.lane.b32.xlu1 %v1461_v56, %s1367_s3  ;;  %v1501_v27 = vmax.f32 %v231_v13, 0.0  ;;  %v1505_v28 = vmax.f32 %v178_v18, 0.0  ;;  %v1779_v10 = vld [vmem:[%s2801_s7 + $0x18] sm:$0xff] }
 0x173   :  { %v184_v19 = vadd.f32 %v183_v16, %v101_v62  ;;  %v237_v20 = vadd.f32 %v236_v17, %v101_v62  ;;  %1116 = vmatpush1.bf16.msra.mxu0 %v1103_v0  ;;  %v1487_v21 = vmax.f32 %v180_v7, 0.0  ;;  %v1493_v23 = vmax.f32 %v233_v8, 0.0  ;;  %v1771_v7 = vld [vmem:[%s2801_s7] sm:$0xff] }
 0x174   :  { %v1489_v22 = vmax.f32 %v235_v15, 0.0  ;;  %358 = vrot.lane.b32.xlu0 %v1455_v47, %s1368_s21  ;;  %v1495_v24 = vmax.f32 %v182_v14, 0.0  ;;  %v1737_v63 = vand.u32 127, %v41_v9  ;;  %v1763_v9 = vld [vmem:[%s2801_s7 + $0x10] sm:$0xff]  ;;  %v1766_v5 = vrot.slane %v1751_v3, %v312_v2 }
 0x175   :  { %v1497_v25 = vmax.f32 %v184_v19, 0.0  ;;  %v1499_v26 = vmax.f32 %v237_v20, 0.0  ;;  %v409_v12 = vsub.s32 1, %v1440_v11  ;;  %v1785_v14 = vrot.slane %v1763_v9, %v312_v2 }
 0x176   :  { %360 = vrot.lane.b32.xlu1 %v1459_v55, %s1368_s21  ;;  %v1109_v31 = vpack.c.bf16 %v1489_v22, %v1501_v27  ;;  %v1107_v32 = vpack.c.bf16 %v1495_v24, %v1505_v28  ;;  %vm293_vm3 = vcmp.lt.s32.totalorder %v1737_v63, 17  ;;  %2902 = vst [vmem:[#allocation6_spill] sm:$0xff] %v1766_v5  ;;  %v1791_v16 = vrot.slane %v1771_v7, %v312_v2 }
 0x177   :  { %v1108_v29 = vpack.c.bf16 %v1497_v25, %v1487_v21  ;;  %v1110_v30 = vpack.c.bf16 %v1499_v26, %v1493_v23  ;;  %v1801_v20 = vrot.slane %v1779_v10, %v312_v2  ;;  %vm390_vm4 = vcmp.lt.s32.totalorder %v1737_v63, 16 }
 0x178   :  { %374 = vrot.lane.b32.xlu0 %v1457_v54, %s1368_s21  ;;  %vm487_vm5 = vcmp.lt.s32.totalorder %v1737_v63, 15  ;;  %vm584_vm6 = vcmp.lt.s32.totalorder %v1737_v63, 1  ;;  %vm681_vm7 = vcmp.lt.s32.totalorder %v1737_v63, 127  ;;  %vm778_vm8 = vcmp.lt.s32.totalorder %v1737_v63, 113 }
 0x179   :  { %1117 = vmatprep.subr.bf16.mxu0 %v1108_v29  ;;  %1158 = vmatprep.subr.bf16.mxu1 %v1110_v30  ;;  %vm875_vm9 = vcmp.lt.s32.totalorder %v1737_v63, 112  ;;  %vm972_vm10 = vcmp.lt.s32.totalorder %v1737_v63, 111 }
 0x17a   :  { %1159 = vmatpush1.bf16.msra.mxu1 %v1109_v31  ;;  %376 = vrot.lane.b32.xlu1 %v1461_v56, %s1368_s21 }
 0x17b   :  { %1118 = vmatpush1.bf16.msra.mxu0 %v1107_v32  ;;  %v1811_v32 = vrot.slane %v1751_v3, %v409_v12 }
 0x17c   :  { %455 = vrot.lane.b32.xlu0 %v1455_v47, %s1369_s22 }
 0x17d   :  { %1313 = vmatmul.mubr.msk.bf16.vlgmr.msra.gmra.mrb[8].mxu1 %vm1111_vm2, %v1102_v33 }
 0x17e   :  { %457 = vrot.lane.b32.xlu1 %v1459_v55, %s1369_s22  ;;  %1312 = vmatmul.mubr.msk.bf16.vlgmr.msra.gmra.mrb[8].mxu0 %vm1111_vm2, %v1102_v33 }
 0x180   :  { %471 = vrot.lane.b32.xlu0 %v1457_v54, %s1369_s22 }
 0x182   :  { %473 = vrot.lane.b32.xlu1 %v1461_v56, %s1369_s22 }
 0x184   :  { %552 = vrot.lane.b32.xlu0 %v1455_v47, %s1370_s23 }
 0x186   :  { %554 = vrot.lane.b32.xlu1 %v1459_v55, %s1370_s23 }
 0x188   :  { %568 = vrot.lane.b32.xlu0 %v1457_v54, %s1370_s23 }
 0x18a   :  { %570 = vrot.lane.b32.xlu1 %v1461_v56, %s1370_s23 }
 0x18c   :  { %649 = vrot.lane.b32.xlu0 %v1455_v47, %s1371_s24 }
 0x18e   :  { %651 = vrot.lane.b32.xlu1 %v1459_v55, %s1371_s24 }
 0x190   :  { %665 = vrot.lane.b32.xlu0 %v1457_v54, %s1371_s24 }
 0x192   :  { %667 = vrot.lane.b32.xlu1 %v1461_v56, %s1371_s24 }
 0x194   :  { %746 = vrot.lane.b32.xlu0 %v1455_v47, %s1372_s25 }
 0x196   :  { %748 = vrot.lane.b32.xlu1 %v1459_v55, %s1372_s25 }
 0x198   :  { %762 = vrot.lane.b32.xlu0 %v1457_v54, %s1372_s25 }
 0x19a   :  { %764 = vrot.lane.b32.xlu1 %v1461_v56, %s1372_s25 }
 0x19c   :  { %843 = vrot.lane.b32.xlu0 %v1455_v47, %s1373_s26 }
 0x19e   :  { %845 = vrot.lane.b32.xlu1 %v1459_v55, %s1373_s26 }
 0x1a0   :  { %859 = vrot.lane.b32.xlu0 %v1457_v54, %s1373_s26 }
 0x1a2   :  { %861 = vrot.lane.b32.xlu1 %v1461_v56, %s1373_s26 }
 0x1a4   :  { %940 = vrot.lane.b32.xlu0 %v1455_v47, %s1374_s27 }
 0x1a6   :  { %942 = vrot.lane.b32.xlu1 %v1459_v55, %s1374_s27 }
 0x1a8   :  { %956 = vrot.lane.b32.xlu0 %v1457_v54, %s1374_s27 }
 0x1aa   :  { %958 = vrot.lane.b32.xlu1 %v1461_v56, %s1374_s27 }
 0x1ac   :  { %267 = vrot.lane.b32.xlu0 %v1465_v57, %s1367_s3 }
 0x1ae   :  { %269 = vrot.lane.b32.xlu1 %v1469_v59, %s1367_s3 }
 0x1b0   :  { %283 = vrot.lane.b32.xlu0 %v1467_v58, %s1367_s3 }
 0x1b2   :  { %285 = vrot.lane.b32.xlu1 %v1471_v60, %s1367_s3 }
 0x1b4   :  { %366 = vrot.lane.b32.xlu0 %v1465_v57, %s1368_s21 }
 0x1b6   :  { %368 = vrot.lane.b32.xlu1 %v1469_v59, %s1368_s21 }
 0x1b8   :  { %382 = vrot.lane.b32.xlu0 %v1467_v58, %s1368_s21 }
 0x1ba   :  { %384 = vrot.lane.b32.xlu1 %v1471_v60, %s1368_s21 }
 0x1bc   :  { %463 = vrot.lane.b32.xlu0 %v1465_v57, %s1369_s22 }
 0x1be   :  { %465 = vrot.lane.b32.xlu1 %v1469_v59, %s1369_s22 }
 0x1c0   :  { %479 = vrot.lane.b32.xlu0 %v1467_v58, %s1369_s22 }
 0x1c2   :  { %481 = vrot.lane.b32.xlu1 %v1471_v60, %s1369_s22 }
 0x1c4   :  { %560 = vrot.lane.b32.xlu0 %v1465_v57, %s1370_s23 }
 0x1c6   :  { %562 = vrot.lane.b32.xlu1 %v1469_v59, %s1370_s23 }
 0x1c8   :  { %576 = vrot.lane.b32.xlu0 %v1467_v58, %s1370_s23 }
 0x1ca   :  { %578 = vrot.lane.b32.xlu1 %v1471_v60, %s1370_s23 }
 0x1cc   :  { %657 = vrot.lane.b32.xlu0 %v1465_v57, %s1371_s24 }
 0x1ce   :  { %659 = vrot.lane.b32.xlu1 %v1469_v59, %s1371_s24 }
 0x1d0   :  { %673 = vrot.lane.b32.xlu0 %v1467_v58, %s1371_s24 }
 0x1d2   :  { %675 = vrot.lane.b32.xlu1 %v1471_v60, %s1371_s24 }
 0x1d4   :  { %754 = vrot.lane.b32.xlu0 %v1465_v57, %s1372_s25 }
 0x1d6   :  { %756 = vrot.lane.b32.xlu1 %v1469_v59, %s1372_s25 }
 0x1d8   :  { %770 = vrot.lane.b32.xlu0 %v1467_v58, %s1372_s25 }
 0x1da   :  { %772 = vrot.lane.b32.xlu1 %v1471_v60, %s1372_s25 }
 0x1dc   :  { %851 = vrot.lane.b32.xlu0 %v1465_v57, %s1373_s26 }
 0x1de   :  { %853 = vrot.lane.b32.xlu1 %v1469_v59, %s1373_s26  ;;  %v1622_v34 = vpop.permute.xlu0 %259 }
 0x1e0   :  { %v1624_v35 = vpop.permute.xlu1 %261  ;;  %867 = vrot.lane.b32.xlu0 %v1467_v58, %s1373_s26 }
 0x1e2   :  { %869 = vrot.lane.b32.xlu1 %v1471_v60, %s1373_s26  ;;  %v1630_v36 = vpop.permute.xlu0 %275 }
 0x1e4   :  { %v1632_v37 = vpop.permute.xlu1 %277  ;;  %948 = vrot.lane.b32.xlu0 %v1465_v57, %s1374_s27 }
 0x1e6   :  { %950 = vrot.lane.b32.xlu1 %v1469_v59, %s1374_s27  ;;  %v1638_v38 = vpop.permute.xlu0 %358 }
 0x1e8   :  { %v1640_v39 = vpop.permute.xlu1 %360  ;;  %964 = vrot.lane.b32.xlu0 %v1467_v58, %s1374_s27 }
 0x1ea   :  { %966 = vrot.lane.b32.xlu1 %v1471_v60, %s1374_s27  ;;  %v1646_v40 = vpop.permute.xlu0 %374 }
 0x1ec   :  { %v1648_v41 = vpop.permute.xlu1 %376  ;;  %263 = vrot.lane.b32.xlu0 %v1505_v28, %s1367_s3 }
 0x1ee   :  { %265 = vrot.lane.b32.xlu1 %v1495_v24, %s1367_s3  ;;  %v1654_v42 = vpop.permute.xlu0 %455 }
 0x1f0   :  { %v1656_v43 = vpop.permute.xlu1 %457  ;;  %279 = vrot.lane.b32.xlu0 %v1501_v27, %s1367_s3 }
 0x1f2   :  { %281 = vrot.lane.b32.xlu1 %v1489_v22, %s1367_s3  ;;  %v1662_v44 = vpop.permute.xlu0 %471 }
 0x1f4   :  { %v1664_v45 = vpop.permute.xlu1 %473  ;;  %362 = vrot.lane.b32.xlu0 %v1505_v28, %s1368_s21 }
 0x1f6   :  { %364 = vrot.lane.b32.xlu1 %v1495_v24, %s1368_s21  ;;  %v1670_v46 = vpop.permute.xlu0 %552 }
 0x1f8   :  { %v1672_v47 = vpop.permute.xlu1 %554  ;;  %378 = vrot.lane.b32.xlu0 %v1501_v27, %s1368_s21 }
 0x1fa   :  { %380 = vrot.lane.b32.xlu1 %v1489_v22, %s1368_s21  ;;  %v1678_v48 = vpop.permute.xlu0 %568 }
 0x1fc   :  { %v1680_v49 = vpop.permute.xlu1 %570  ;;  %459 = vrot.lane.b32.xlu0 %v1505_v28, %s1369_s22 }
 0x1fe   :  { %461 = vrot.lane.b32.xlu1 %v1495_v24, %s1369_s22  ;;  %v1686_v50 = vpop.permute.xlu0 %649 }
 0x200   :  { %v1688_v51 = vpop.permute.xlu1 %651  ;;  %475 = vrot.lane.b32.xlu0 %v1501_v27, %s1369_s22 }
 0x202   :  { %477 = vrot.lane.b32.xlu1 %v1489_v22, %s1369_s22  ;;  %v1694_v52 = vpop.permute.xlu0 %665 }
 0x204   :  { %v1696_v53 = vpop.permute.xlu1 %667  ;;  %556 = vrot.lane.b32.xlu0 %v1505_v28, %s1370_s23 }
 0x206   :  { %558 = vrot.lane.b32.xlu1 %v1495_v24, %s1370_s23  ;;  %v1702_v54 = vpop.permute.xlu0 %746 }
 0x208   :  { %v1704_v55 = vpop.permute.xlu1 %748  ;;  %572 = vrot.lane.b32.xlu0 %v1501_v27, %s1370_s23 }
 0x20a   :  { %574 = vrot.lane.b32.xlu1 %v1489_v22, %s1370_s23  ;;  %v1710_v56 = vpop.permute.xlu0 %762 }
 0x20c   :  { %v1712_v57 = vpop.permute.xlu1 %764  ;;  %653 = vrot.lane.b32.xlu0 %v1505_v28, %s1371_s24 }
 0x20e   :  { %655 = vrot.lane.b32.xlu1 %v1495_v24, %s1371_s24  ;;  %v1718_v58 = vpop.permute.xlu0 %843 }
 0x210   :  { %v1720_v59 = vpop.permute.xlu1 %845  ;;  %669 = vrot.lane.b32.xlu0 %v1501_v27, %s1371_s24 }
 0x212   :  { %671 = vrot.lane.b32.xlu1 %v1489_v22, %s1371_s24  ;;  %v1726_v60 = vpop.permute.xlu0 %859 }
 0x214   :  { %v1728_v61 = vpop.permute.xlu1 %861  ;;  %750 = vrot.lane.b32.xlu0 %v1505_v28, %s1372_s25 }
 0x216   :  { %752 = vrot.lane.b32.xlu1 %v1495_v24, %s1372_s25  ;;  %v1734_v62 = vpop.permute.xlu0 %940 }
 0x218   :  { %v1739_v0 = vpop.permute.xlu1 %942  ;;  %766 = vrot.lane.b32.xlu0 %v1501_v27, %s1372_s25 }
 0x21a   :  { %768 = vrot.lane.b32.xlu1 %v1489_v22, %s1372_s25  ;;  %v1745_v1 = vpop.permute.xlu0 %956 }
 0x21c   :  { %v1753_v4 = vpop.permute.xlu1 %958  ;;  %847 = vrot.lane.b32.xlu0 %v1505_v28, %s1373_s26 }
 0x21e   :  { %849 = vrot.lane.b32.xlu1 %v1495_v24, %s1373_s26  ;;  %v268_v6 = vpop.permute.xlu0 %267 }
 0x21f   :  { %v302_v8 = vsel %vm293_vm3, %v1622_v34, %v268_v6  ;;  %v298_v33 = vsel %vm293_vm3, %v268_v6, %v1630_v36 }
 0x220   :  { %v270_v13 = vpop.permute.xlu1 %269  ;;  %863 = vrot.lane.b32.xlu0 %v1501_v27, %s1373_s26  ;;  %v327_v17 = vmul.f32 %v1766_v5, %v302_v8  ;;  %v1819_v8 = vrot.slane %v1763_v9, %v409_v12 }
 0x221   :  { %v303_v15 = vsel %vm293_vm3, %v1624_v35, %v270_v13  ;;  %v299_v18 = vsel %vm293_vm3, %v270_v13, %v1632_v37 }
 0x222   :  { %v331_v19 = vmul.f32 %v1766_v5, %v303_v15  ;;  %865 = vrot.lane.b32.xlu1 %v1489_v22, %s1373_s26  ;;  %v284_v29 = vpop.permute.xlu0 %283  ;;  %v1822_v15 = vrot.slane %v1771_v7, %v409_v12 }
 0x223   :  { %v294_v30 = vsel %vm293_vm3, %v1630_v36, %v284_v29  ;;  %v306_v31 = vsel %vm293_vm3, %v284_v29, %v1622_v34  ;;  %v332_v34 = vmul.f32 %v1785_v14, %v299_v18 }
 0x224   :  { %v286_v2 = vpop.permute.xlu1 %285  ;;  %944 = vrot.lane.b32.xlu0 %v1505_v28, %s1374_s27  ;;  %v343_v13 = vpack.c.bf16 %v331_v19, %v327_v17  ;;  %v326_v29 = vmul.f32 %v1791_v16, %v306_v31  ;;  %v329_v28 = vmul.f32 %v1801_v20, %v294_v30  ;;  %v506_v19 = vsub.s32 2, %v1440_v11 }
 0x225   :  { %v295_v5 = vsel %vm293_vm3, %v1632_v37, %v286_v2  ;;  %v307_v36 = vsel %vm293_vm3, %v286_v2, %v1624_v35  ;;  %v328_v31 = vmul.f32 %v1785_v14, %v298_v33  ;;  %v1846_v30 = vrot.slane %v1779_v10, %v409_v12 }
 0x226   :  { %v330_v6 = vmul.f32 %v1791_v16, %v307_v36  ;;  %v333_v17 = vmul.f32 %v1801_v20, %v295_v5  ;;  %946 = vrot.lane.b32.xlu1 %v1495_v24, %s1374_s27  ;;  %v367_v18 = vpop.permute.xlu0 %366  ;;  %1204 = vmatprep.subr.bf16.mxu0 %v343_v13 }
 0x227   :  { %v395_v37 = vsel %vm390_vm4, %v367_v18, %v1646_v40  ;;  %v399_v35 = vsel %vm390_vm4, %v1638_v38, %v367_v18  ;;  %v344_v36 = vpack.c.bf16 %v332_v34, %v328_v31  ;;  %v1871_v34 = vrot.slane %v1751_v3, %v506_v19 }
 0x228   :  { %v342_v5 = vpack.c.bf16 %v330_v6, %v326_v29  ;;  %v1849_v24 = vmul.f32 %v1811_v32, %v399_v35  ;;  %v1852_v2 = vmul.f32 %v1819_v8, %v395_v37  ;;  %v369_v13 = vpop.permute.xlu1 %368  ;;  %960 = vrot.lane.b32.xlu0 %v1501_v27, %s1374_s27  ;;  %v345_v33 = vpack.c.bf16 %v333_v17, %v329_v28 }
 0x229   :  { %v396_v18 = vsel %vm390_vm4, %v369_v13, %v1648_v41  ;;  %v400_v12 = vsel %vm390_vm4, %v1640_v39, %v369_v13  ;;  %2903 = vst [vmem:[#allocation7_spill] sm:$0xff] %v1871_v34  ;;  %v1881_v31 = vrot.slane %v1763_v9, %v506_v19 }
 0x22a   :  { %v1863_v29 = vmul.f32 %v1811_v32, %v400_v12  ;;  %v1866_v6 = vmul.f32 %v1819_v8, %v396_v18  ;;  %962 = vrot.lane.b32.xlu1 %v1489_v22, %s1374_s27  ;;  %1245 = vmatprep.subr.bf16.mxu1 %v345_v33  ;;  %v383_v27 = vpop.permute.xlu0 %382  ;;  %v1910_v12 = vrot.slane %v1771_v7, %v506_v19 }
 0x22b   :  { %v391_v28 = vsel %vm390_vm4, %v1646_v40, %v383_v27  ;;  %v403_v17 = vsel %vm390_vm4, %v383_v27, %v1638_v38  ;;  %1205 = vmatpush1.bf16.msra.mxu0 %v342_v5  ;;  %1246 = vmatpush1.bf16.msra.mxu1 %v344_v36  ;;  %2904 = vst [vmem:[#allocation8_spill] sm:$0xff] %v1881_v31 }
 0x22c   :  { %v1886_v37 = vmul.f32 %v1822_v15, %v403_v17  ;;  %v1889_v35 = vmul.f32 %v1846_v30, %v391_v28  ;;  %v385_v40 = vpop.permute.xlu1 %384  ;;  %271 = vrot.lane.b32.xlu0 %v1487_v21, %s1367_s3  ;;  %2905 = vst [vmem:[#allocation9_spill] sm:$0xff] %v1910_v12  ;;  %v1919_v27 = vrot.slane %v1779_v10, %v506_v19  ;;  %v603_v28 = vsub.s32 3, %v1440_v11 }
 0x22d   :  { %v392_v5 = vsel %vm390_vm4, %v1648_v41, %v385_v40  ;;  %v404_v13 = vsel %vm390_vm4, %v385_v40, %v1640_v39 }
 0x22e   :  { %v1902_v33 = vmul.f32 %v1822_v15, %v404_v13  ;;  %v1905_v36 = vmul.f32 %v1846_v30, %v392_v5  ;;  %273 = vrot.lane.b32.xlu1 %v1497_v25, %s1367_s3  ;;  %v464_v18 = vpop.permute.xlu0 %463  ;;  %2906 = vst [vmem:[#allocation10_spill] sm:$0xff] %v1919_v27 }
 0x22f   :  { %v492_v41 = vsel %vm487_vm5, %v464_v18, %v1662_v44  ;;  %v496_v39 = vsel %vm487_vm5, %v1654_v42, %v464_v18 }
 0x230   :  { %v1925_v40 = vmul.f32 %v1871_v34, %v496_v39  ;;  %v1928_v5 = vmul.f32 %v1881_v31, %v492_v41  ;;  %v466_v13 = vpop.permute.xlu1 %465  ;;  %287 = vrot.lane.b32.xlu0 %v1493_v23, %s1367_s3 }
 0x231   :  { %v493_v19 = vsel %vm487_vm5, %v466_v13, %v1664_v45  ;;  %v497_v22 = vsel %vm487_vm5, %v1656_v43, %v466_v13 }
 0x232   :  { %2907 = vst [vmem:[#allocation11_spill] sm:$0xff] %v1928_v5  ;;  %v1941_v39 = vmul.f32 %v1871_v34, %v497_v22  ;;  %v1944_v41 = vmul.f32 %v1881_v31, %v493_v19  ;;  %289 = vrot.lane.b32.xlu1 %v1499_v26, %s1367_s3  ;;  %v480_v17 = vpop.permute.xlu0 %479  ;;  %v1956_v22 = vrot.slane %v1751_v3, %v603_v28 }
 0x233   :  { %v488_v18 = vsel %vm487_vm5, %v1662_v44, %v480_v17  ;;  %v500_v13 = vsel %vm487_vm5, %v480_v17, %v1654_v42  ;;  %v1959_v19 = vrot.slane %v1763_v9, %v603_v28  ;;  %v1988_v42 = vrot.slane %v1771_v7, %v603_v28 }
 0x234   :  { %2908 = vst [vmem:[#allocation12_spill] sm:$0xff] %v1944_v41  ;;  %2909 = vst [vmem:[#allocation13_spill] sm:$0xff] %v1956_v22  ;;  %v1964_v31 = vmul.f32 %v1910_v12, %v500_v13  ;;  %v1967_v34 = vmul.f32 %v1919_v27, %v488_v18  ;;  %v482_v44 = vpop.permute.xlu1 %481  ;;  %370 = vrot.lane.b32.xlu0 %v1487_v21, %s1368_s21 }
 0x235   :  { %2910 = vst [vmem:[#allocation14_spill] sm:$0xff] %v1959_v19  ;;  %v489_v17 = vsel %vm487_vm5, %v1664_v45, %v482_v44  ;;  %v501_v38 = vsel %vm487_vm5, %v482_v44, %v1656_v43  ;;  %2913 = vst [vmem:[#allocation17_spill] sm:$0xff] %v1988_v42  ;;  %v700_v44 = vsub.s32 4, %v1440_v11 }
 0x236   :  { %2911 = vst [vmem:[#allocation15_spill] sm:$0xff] %v1964_v31  ;;  %v1980_v13 = vmul.f32 %v1910_v12, %v501_v38  ;;  %v1983_v18 = vmul.f32 %v1919_v27, %v489_v17  ;;  %372 = vrot.lane.b32.xlu1 %v1497_v25, %s1368_s21  ;;  %v561_v5 = vpop.permute.xlu0 %560  ;;  %v1997_v38 = vrot.slane %v1779_v10, %v603_v28 }
 0x237   :  { %v589_v45 = vsel %vm584_vm6, %v561_v5, %v1678_v48  ;;  %v593_v43 = vsel %vm584_vm6, %v1670_v46, %v561_v5 }
 0x238   :  { %2912 = vst [vmem:[#allocation16_spill] sm:$0xff] %v1980_v13  ;;  %2914 = vst [vmem:[#allocation18_spill] sm:$0xff] %v1997_v38  ;;  %v2003_v41 = vmul.f32 %v1956_v22, %v593_v43  ;;  %v2006_v27 = vmul.f32 %v1959_v19, %v589_v45  ;;  %v563_v12 = vpop.permute.xlu1 %562  ;;  %386 = vrot.lane.b32.xlu0 %v1493_v23, %s1368_s21 }
 0x239   :  { %v590_v28 = vsel %vm584_vm6, %v563_v12, %v1680_v49  ;;  %v594_v17 = vsel %vm584_vm6, %v1672_v47, %v563_v12 }
 0x23a   :  { %2915 = vst [vmem:[#allocation19_spill] sm:$0xff] %v2006_v27  ;;  %v2019_v43 = vmul.f32 %v1956_v22, %v594_v17  ;;  %v2022_v45 = vmul.f32 %v1959_v19, %v590_v28  ;;  %388 = vrot.lane.b32.xlu1 %v1499_v26, %s1368_s21  ;;  %v577_v31 = vpop.permute.xlu0 %576  ;;  %v2034_v17 = vrot.slane %v1771_v7, %v700_v44 }
 0x23b   :  { %v585_v5 = vsel %vm584_vm6, %v1678_v48, %v577_v31  ;;  %v597_v12 = vsel %vm584_vm6, %v577_v31, %v1670_v46  ;;  %v2037_v28 = vrot.slane %v1751_v3, %v700_v44  ;;  %v2066_v46 = vrot.slane %v1763_v9, %v700_v44 }
 0x23c   :  { %2916 = vst [vmem:[#allocation20_spill] sm:$0xff] %v2022_v45  ;;  %2917 = vst [vmem:[#allocation21_spill] sm:$0xff] %v2034_v17  ;;  %v2042_v22 = vmul.f32 %v1988_v42, %v597_v12  ;;  %v2045_v13 = vmul.f32 %v1997_v38, %v585_v5  ;;  %v579_v48 = vpop.permute.xlu1 %578  ;;  %467 = vrot.lane.b32.xlu0 %v1487_v21, %s1369_s22 }
 0x23d   :  { %2918 = vst [vmem:[#allocation22_spill] sm:$0xff] %v2037_v28  ;;  %v586_v31 = vsel %vm584_vm6, %v1680_v49, %v579_v48  ;;  %v598_v19 = vsel %vm584_vm6, %v579_v48, %v1672_v47  ;;  %2921 = vst [vmem:[#allocation25_spill] sm:$0xff] %v2066_v46  ;;  %v797_v48 = vsub.s32 5, %v1440_v11 }
 0x23e   :  { %2919 = vst [vmem:[#allocation23_spill] sm:$0xff] %v2042_v22  ;;  %v2058_v12 = vmul.f32 %v1988_v42, %v598_v19  ;;  %v2061_v5 = vmul.f32 %v1997_v38, %v586_v31  ;;  %469 = vrot.lane.b32.xlu1 %v1497_v25, %s1369_s22  ;;  %v658_v27 = vpop.permute.xlu0 %657  ;;  %v2075_v19 = vrot.slane %v1779_v10, %v700_v44 }
 0x23f   :  { %v686_v49 = vsel %vm681_vm7, %v658_v27, %v1694_v52  ;;  %v690_v47 = vsel %vm681_vm7, %v1686_v50, %v658_v27 }
 0x240   :  { %2920 = vst [vmem:[#allocation24_spill] sm:$0xff] %v2058_v12  ;;  %2922 = vst [vmem:[#allocation26_spill] sm:$0xff] %v2075_v19  ;;  %v2081_v45 = vmul.f32 %v2034_v17, %v690_v47  ;;  %v2084_v38 = vmul.f32 %v2037_v28, %v686_v49  ;;  %v660_v42 = vpop.permute.xlu1 %659  ;;  %483 = vrot.lane.b32.xlu0 %v1493_v23, %s1369_s22 }
 0x241   :  { %v687_v44 = vsel %vm681_vm7, %v660_v42, %v1696_v53  ;;  %v691_v31 = vsel %vm681_vm7, %v1688_v51, %v660_v42 }
 0x242   :  { %2923 = vst [vmem:[#allocation27_spill] sm:$0xff] %v2081_v45  ;;  %v2097_v47 = vmul.f32 %v2034_v17, %v691_v31  ;;  %v2100_v49 = vmul.f32 %v2037_v28, %v687_v44  ;;  %485 = vrot.lane.b32.xlu1 %v1499_v26, %s1369_s22  ;;  %v674_v22 = vpop.permute.xlu0 %673  ;;  %v2112_v31 = vrot.slane %v1771_v7, %v797_v48 }
 0x243   :  { %v682_v27 = vsel %vm681_vm7, %v1694_v52, %v674_v22  ;;  %v694_v42 = vsel %vm681_vm7, %v674_v22, %v1686_v50  ;;  %v2115_v44 = vrot.slane %v1751_v3, %v797_v48  ;;  %v2144_v50 = vrot.slane %v1763_v9, %v797_v48 }
 0x244   :  { %2924 = vst [vmem:[#allocation28_spill] sm:$0xff] %v2097_v47  ;;  %2925 = vst [vmem:[#allocation29_spill] sm:$0xff] %v2112_v31  ;;  %v2120_v17 = vmul.f32 %v2066_v46, %v682_v27  ;;  %v2123_v12 = vmul.f32 %v2075_v19, %v694_v42  ;;  %v676_v52 = vpop.permute.xlu1 %675  ;;  %564 = vrot.lane.b32.xlu0 %v1487_v21, %s1370_s23 }
 0x245   :  { %2926 = vst [vmem:[#allocation30_spill] sm:$0xff] %v2115_v44  ;;  %v683_v22 = vsel %vm681_vm7, %v1696_v53, %v676_v52  ;;  %v695_v28 = vsel %vm681_vm7, %v676_v52, %v1688_v51  ;;  %2929 = vst [vmem:[#allocation33_spill] sm:$0xff] %v2144_v50  ;;  %v2153_v52 = vrot.slane %v1779_v10, %v797_v48 }
 0x246   :  { %2927 = vst [vmem:[#allocation31_spill] sm:$0xff] %v2120_v17  ;;  %v2136_v27 = vmul.f32 %v2066_v46, %v683_v22  ;;  %v2139_v42 = vmul.f32 %v2075_v19, %v695_v28  ;;  %566 = vrot.lane.b32.xlu1 %v1497_v25, %s1370_s23  ;;  %v755_v45 = vpop.permute.xlu0 %754  ;;  %v894_v28 = vsub.s32 6, %v1440_v11 }
 0x247   :  { %v783_v53 = vsel %vm778_vm8, %v755_v45, %v1710_v56  ;;  %v787_v51 = vsel %vm778_vm8, %v1702_v54, %v755_v45  ;;  %2930 = vst [vmem:[#allocation34_spill] sm:$0xff] %v2153_v52 }
 0x248   :  { %2928 = vst [vmem:[#allocation32_spill] sm:$0xff] %v2136_v27  ;;  %v2159_v47 = vmul.f32 %v2112_v31, %v787_v51  ;;  %v2162_v19 = vmul.f32 %v2115_v44, %v783_v53  ;;  %v757_v46 = vpop.permute.xlu1 %756  ;;  %580 = vrot.lane.b32.xlu0 %v1493_v23, %s1370_s23 }
 0x249   :  { %v784_v48 = vsel %vm778_vm8, %v757_v46, %v1712_v57  ;;  %v788_v22 = vsel %vm778_vm8, %v1704_v55, %v757_v46 }
 0x24a   :  { %2931 = vst [vmem:[#allocation35_spill] sm:$0xff] %v2159_v47  ;;  %2932 = vst [vmem:[#allocation36_spill] sm:$0xff] %v2162_v19  ;;  %v2175_v51 = vmul.f32 %v2112_v31, %v788_v22  ;;  %v2178_v53 = vmul.f32 %v2115_v44, %v784_v48  ;;  %582 = vrot.lane.b32.xlu1 %v1499_v26, %s1370_s23  ;;  %v771_v17 = vpop.permute.xlu0 %770  ;;  %v2190_v22 = vrot.slane %v1771_v7, %v894_v28 }
 0x24b   :  { %v779_v45 = vsel %vm778_vm8, %v1710_v56, %v771_v17  ;;  %v791_v46 = vsel %vm778_vm8, %v771_v17, %v1702_v54  ;;  %v2193_v48 = vrot.slane %v1751_v3, %v894_v28  ;;  %v2222_v54 = vrot.slane %v1763_v9, %v894_v28 }
 0x24c   :  { %2933 = vst [vmem:[#allocation37_spill] sm:$0xff] %v2175_v51  ;;  %2934 = vst [vmem:[#allocation38_spill] sm:$0xff] %v2178_v53  ;;  %v2198_v31 = vmul.f32 %v2144_v50, %v779_v45  ;;  %v2201_v27 = vmul.f32 %v2153_v52, %v791_v46  ;;  %v773_v56 = vpop.permute.xlu1 %772  ;;  %661 = vrot.lane.b32.xlu0 %v1487_v21, %s1371_s24 }
 0x24d   :  { %2935 = vst [vmem:[#allocation39_spill] sm:$0xff] %v2190_v22  ;;  %2936 = vst [vmem:[#allocation40_spill] sm:$0xff] %v2193_v48  ;;  %v780_v17 = vsel %vm778_vm8, %v1712_v57, %v773_v56  ;;  %v792_v44 = vsel %vm778_vm8, %v773_v56, %v1704_v55  ;;  %v2231_v56 = vrot.slane %v1779_v10, %v894_v28 }
 0x24e   :  { %2937 = vst [vmem:[#allocation41_spill] sm:$0xff] %v2198_v31  ;;  %2938 = vst [vmem:[#allocation42_spill] sm:$0xff] %v2201_v27  ;;  %v2214_v45 = vmul.f32 %v2144_v50, %v780_v17  ;;  %v2217_v46 = vmul.f32 %v2153_v52, %v792_v44  ;;  %663 = vrot.lane.b32.xlu1 %v1497_v25, %s1371_s24  ;;  %v852_v47 = vpop.permute.xlu0 %851  ;;  %v991_v44 = vsub.s32 7, %v1440_v11 }
 0x24f   :  { %2941 = vst [vmem:[#allocation45_spill] sm:$0xff] %v2222_v54  ;;  %v880_v57 = vsel %vm875_vm9, %v852_v47, %v1726_v60  ;;  %v884_v55 = vsel %vm875_vm9, %v1718_v58, %v852_v47  ;;  %2942 = vst [vmem:[#allocation46_spill] sm:$0xff] %v2231_v56 }
 0x250   :  { %2939 = vst [vmem:[#allocation43_spill] sm:$0xff] %v2214_v45  ;;  %2940 = vst [vmem:[#allocation44_spill] sm:$0xff] %v2217_v46  ;;  %v2237_v51 = vmul.f32 %v2190_v22, %v884_v55  ;;  %v2240_v52 = vmul.f32 %v2193_v48, %v880_v57  ;;  %v854_v50 = vpop.permute.xlu1 %853  ;;  %677 = vrot.lane.b32.xlu0 %v1493_v23, %s1371_s24 }
 0x251   :  { %v881_v11 = vsel %vm875_vm9, %v854_v50, %v1728_v61  ;;  %v885_v28 = vsel %vm875_vm9, %v1720_v59, %v854_v50 }
 0x252   :  { %2943 = vst [vmem:[#allocation47_spill] sm:$0xff] %v2237_v51  ;;  %2944 = vst [vmem:[#allocation48_spill] sm:$0xff] %v2240_v52  ;;  %v2253_v55 = vmul.f32 %v2190_v22, %v885_v28  ;;  %v2256_v57 = vmul.f32 %v2193_v48, %v881_v11  ;;  %679 = vrot.lane.b32.xlu1 %v1499_v26, %s1371_s24  ;;  %v868_v17 = vpop.permute.xlu0 %867  ;;  %v2268_v28 = vrot.slane %v1771_v7, %v991_v44 }
 0x253   :  { %v876_v47 = vsel %vm875_vm9, %v1726_v60, %v868_v17  ;;  %v888_v50 = vsel %vm875_vm9, %v868_v17, %v1718_v58  ;;  %v2271_v11 = vrot.slane %v1751_v3, %v991_v44 }
 0x254   :  { %2945 = vst [vmem:[#allocation49_spill] sm:$0xff] %v2253_v55  ;;  %2946 = vst [vmem:[#allocation50_spill] sm:$0xff] %v2256_v57  ;;  %v2276_v22 = vmul.f32 %v2222_v54, %v876_v47  ;;  %v2279_v31 = vmul.f32 %v2231_v56, %v888_v50  ;;  %v870_v60 = vpop.permute.xlu1 %869  ;;  %758 = vrot.lane.b32.xlu0 %v1487_v21, %s1372_s25 }
 0x255   :  { %2947 = vst [vmem:[#allocation51_spill] sm:$0xff] %v2268_v28  ;;  %2948 = vst [vmem:[#allocation52_spill] sm:$0xff] %v2271_v11  ;;  %v877_v3 = vsel %vm875_vm9, %v1728_v61, %v870_v60  ;;  %v889_v7 = vsel %vm875_vm9, %v870_v60, %v1720_v59  ;;  %v2306_v59 = vrot.slane %v1763_v9, %v991_v44 }
 0x256   :  { %2949 = vst [vmem:[#allocation53_spill] sm:$0xff] %v2276_v22  ;;  %2950 = vst [vmem:[#allocation54_spill] sm:$0xff] %v2279_v31  ;;  %v2292_v17 = vmul.f32 %v2222_v54, %v877_v3  ;;  %v2295_v47 = vmul.f32 %v2231_v56, %v889_v7  ;;  %760 = vrot.lane.b32.xlu1 %v1497_v25, %s1372_s25  ;;  %v949_v50 = vpop.permute.xlu0 %948  ;;  %v2309_v60 = vrot.slane %v1779_v10, %v991_v44 }
 0x257   :  { %v977_v48 = vsel %vm972_vm10, %v949_v50, %v1745_v1  ;;  %v981_v61 = vsel %vm972_vm10, %v1734_v62, %v949_v50  ;;  %2953 = vst [vmem:[#allocation57_spill] sm:$0xff] %v2306_v59 }
 0x258   :  { %2951 = vst [vmem:[#allocation55_spill] sm:$0xff] %v2292_v17  ;;  %2952 = vst [vmem:[#allocation56_spill] sm:$0xff] %v2295_v47  ;;  %v2314_v7 = vmul.f32 %v2268_v28, %v981_v61  ;;  %v2317_v58 = vmul.f32 %v2271_v11, %v977_v48  ;;  %v951_v51 = vpop.permute.xlu1 %950  ;;  %774 = vrot.lane.b32.xlu0 %v1493_v23, %s1372_s25 }
 0x259   :  { %2954 = vst [vmem:[#allocation58_spill] sm:$0xff] %v2309_v60  ;;  %v978_v10 = vsel %vm972_vm10, %v951_v51, %v1753_v4  ;;  %v982_v44 = vsel %vm972_vm10, %v1739_v0, %v951_v51 }
 0x25a   :  { %2955 = vst [vmem:[#allocation59_spill] sm:$0xff] %v2314_v7  ;;  %2956 = vst [vmem:[#allocation60_spill] sm:$0xff] %v2317_v58  ;;  %v2330_v50 = vmul.f32 %v2268_v28, %v982_v44  ;;  %v2333_v48 = vmul.f32 %v2271_v11, %v978_v10  ;;  %776 = vrot.lane.b32.xlu1 %v1499_v26, %s1372_s25  ;;  %v965_v61 = vpop.permute.xlu0 %964 }
 0x25b   :  { %v973_v3 = vsel %vm972_vm10, %v1745_v1, %v965_v61  ;;  %v985_v9 = vsel %vm972_vm10, %v965_v61, %v1734_v62 }
 0x25c   :  { %2957 = vst [vmem:[#allocation61_spill] sm:$0xff] %v2330_v50  ;;  %2958 = vst [vmem:[#allocation62_spill] sm:$0xff] %v2333_v48  ;;  %v2346_v44 = vmul.f32 %v2306_v59, %v973_v3  ;;  %v2349_v10 = vmul.f32 %v2309_v60, %v985_v9  ;;  %v967_v11 = vpop.permute.xlu1 %966  ;;  %855 = vrot.lane.b32.xlu0 %v1487_v21, %s1373_s26 }
 0x25d   :  { %v974_v62 = vsel %vm972_vm10, %v1753_v4, %v967_v11  ;;  %v986_v61 = vsel %vm972_vm10, %v967_v11, %v1739_v0  ;;  %v2380_v11 = vld [vmem:[%s2799_s5] sm:$0xff]  ;;  %s1375_s5 = smov [#allocation3]  }
 0x25e   :  { %2959 = vst [vmem:[#allocation63_spill] sm:$0xff] %v2346_v44  ;;  %2960 = vst [vmem:[#allocation64_spill] sm:$0xff] %v2349_v10  ;;  %v2362_v3 = vmul.f32 %v2306_v59, %v974_v62  ;;  %v2365_v9 = vmul.f32 %v2309_v60, %v986_v61  ;;  %857 = vrot.lane.b32.xlu1 %v1497_v25, %s1373_s26  ;;  %v264_v51 = vpop.permute.xlu0 %263  ;;  %v1315_v62 = vcombine.high %v2380_v11, %v2380_v11  ;;  %s1296_s2 = sshll.u32 %s1375_s5, 4  ;;  %s1297_s2 = int_to_ptr.vmem [resolvable:$true] %s1296_s2 }
 0x25f   :  { %2963 = vst [vmem:[#allocation67_spill] sm:$0xff] %v2380_v11  ;;  %s1341_s15 = scalar_lea.vmem %s1297_s2, 512  ;;  %p1346_p1 = scmp.lt.s32.totalorder %s1297_s2, %s1297_s2 }
 0x260   :  { %2961 = vst [vmem:[#allocation65_spill] sm:$0xff] %v2362_v3  ;;  %2962 = vst [vmem:[#allocation66_spill] sm:$0xff] %v2365_v9  ;;  %v266_v7 = vpop.permute.xlu1 %265  ;;  %871 = vrot.lane.b32.xlu0 %v1493_v23, %s1373_s26  ;;  %1236 = vmatprep.mubr.bf16.mxu0 %v1315_v62  ;;  %p1342_p0 = scmp.ne.s32.totalorder %s1297_s2, %s1341_s15  ;;  %p1347_p2 = scmp.lt.s32.totalorder %s1341_s15, %s1341_s15 }
 0x261   :  { %1277 = vmatprep.mubr.bf16.mxu1 %v1315_v62 }
 0x262   :  { %873 = vrot.lane.b32.xlu1 %v1499_v26, %s1373_s26  ;;  %v280_v4 = vpop.permute.xlu0 %279  ;;  %p1348_p3 = por %p1347_p2, %p1346_p1 }
 0x264   :  { %v282_v61 = vpop.permute.xlu1 %281  ;;  %952 = vrot.lane.b32.xlu0 %v1487_v21, %s1374_s27  ;;  %p1349_p4 = pnand %p1348_p3, %p1342_p0 }
 0x266   :  { %954 = vrot.lane.b32.xlu1 %v1497_v25, %s1374_s27  ;;  %v2388_v1 = vpop.permute.xlu0 %362 }
 0x268   :  { %v2390_v0 = vpop.permute.xlu1 %364  ;;  %968 = vrot.lane.b32.xlu0 %v1493_v23, %s1374_s27 }
 0x26a   :  { %970 = vrot.lane.b32.xlu1 %v1499_v26, %s1374_s27  ;;  %v2396_v11 = vpop.permute.xlu0 %378 }
 0x26c   :  { %v2398_v44 = vpop.permute.xlu1 %380 }
 0x26e   :  { %v2400_v21 = vpop.permute.xlu0 %459 }
 0x270   :  { %v2402_v62 = vpop.permute.xlu1 %461 }
 0x272   :  { %v2404_v3 = vpop.permute.xlu0 %475 }
 0x274   :  { %v2406_v25 = vpop.permute.xlu1 %477 }
 0x276   :  { %v2408_v50 = vpop.permute.xlu0 %556 }
 0x278   :  { %v2410_v10 = vpop.permute.xlu1 %558 }
 0x27a   :  { %v2412_v23 = vpop.permute.xlu0 %572 }
 0x27c   :  { %v2414_v9 = vpop.permute.xlu1 %574 }
 0x27e   :  { %v2416_v26 = vpop.permute.xlu0 %653 }
 0x280   :  { %v2418_v60 = vpop.permute.xlu1 %655 }
 0x282   :  { %v2420_v59 = vpop.permute.xlu0 %669 }
 0x284   :  { %v2422_v58 = vpop.permute.xlu1 %671 }
 0x286   :  { %v2424_v48 = vpop.permute.xlu0 %750 }
 0x287   :  { %2964 = vst [vmem:[#allocation68_spill] sm:$0xff] %v2424_v48 }
 0x288   :  { %v2426_v28 = vpop.permute.xlu1 %752 }
 0x289   :  { %2965 = vst [vmem:[#allocation69_spill] sm:$0xff] %v2426_v28 }
 0x28a   :  { %v2428_v22 = vpop.permute.xlu0 %766 }
 0x28b   :  { %2966 = vst [vmem:[#allocation70_spill] sm:$0xff] %v2428_v22 }
 0x28c   :  { %v2430_v17 = vpop.permute.xlu1 %768 }
 0x28d   :  { %2967 = vst [vmem:[#allocation71_spill] sm:$0xff] %v2430_v17 }
 0x28e   :  { %v2432_v55 = vpop.permute.xlu0 %847 }
 0x28f   :  { %2968 = vst [vmem:[#allocation72_spill] sm:$0xff] %v2432_v55 }
 0x290   :  { %v2434_v31 = vpop.permute.xlu1 %849 }
 0x291   :  { %2969 = vst [vmem:[#allocation73_spill] sm:$0xff] %v2434_v31 }
 0x292   :  { %v2436_v47 = vpop.permute.xlu0 %863 }
 0x293   :  { %2970 = vst [vmem:[#allocation74_spill] sm:$0xff] %v2436_v47 }
 0x294   :  { %v2438_v56 = vpop.permute.xlu1 %865 }
 0x295   :  { %2971 = vst [vmem:[#allocation75_spill] sm:$0xff] %v2438_v56  ;;  %v2976_v56 = vld [vmem:[#allocation6_spill] sm:$0xff] }
 0x296   :  { %v2440_v54 = vpop.permute.xlu0 %944 }
 0x297   :  { %2972 = vst [vmem:[#allocation76_spill] sm:$0xff] %v2440_v54 }
 0x298   :  { %v2442_v52 = vpop.permute.xlu1 %946 }
 0x299   :  { %2973 = vst [vmem:[#allocation77_spill] sm:$0xff] %v2442_v52 }
 0x29a   :  { %v2444_v57 = vpop.permute.xlu0 %960 }
 0x29b   :  { %2974 = vst [vmem:[#allocation78_spill] sm:$0xff] %v2444_v57 }
 0x29c   :  { %v2446_v45 = vpop.permute.xlu1 %962 }
 0x29d   :  { %2975 = vst [vmem:[#allocation79_spill] sm:$0xff] %v2446_v45 }
 0x29e   :  { %v272_v27 = vpop.permute.xlu0 %271 }
 0x29f   :  { %v300_v46 = vsel %vm293_vm3, %v272_v27, %v280_v4  ;;  %v304_v55 = vsel %vm293_vm3, %v264_v51, %v272_v27 }
 0x2a0   :  { %v274_v31 = vpop.permute.xlu1 %273  ;;  %v335_v52 = vmul.f32 %v2976_v56, %v304_v55  ;;  %v336_v57 = vmul.f32 %v1785_v14, %v300_v46 }
 0x2a1   :  { %v301_v47 = vsel %vm293_vm3, %v274_v31, %v282_v61  ;;  %v305_v54 = vsel %vm293_vm3, %v266_v7, %v274_v31 }
 0x2a2   :  { %v339_v45 = vmul.f32 %v2976_v56, %v305_v54  ;;  %v340_v19 = vmul.f32 %v1785_v14, %v301_v47  ;;  %v288_v53 = vpop.permute.xlu0 %287 }
 0x2a3   :  { %v296_v28 = vsel %vm293_vm3, %v280_v4, %v288_v53  ;;  %v308_v27 = vsel %vm293_vm3, %v288_v53, %v264_v51 }
 0x2a4   :  { %v348_v17 = vpack.c.bf16 %v340_v19, %v336_v57  ;;  %v290_v48 = vpop.permute.xlu1 %289  ;;  %v347_v22 = vpack.c.bf16 %v339_v45, %v335_v52  ;;  %v334_v54 = vmul.f32 %v1791_v16, %v308_v27  ;;  %v337_v14 = vmul.f32 %v1801_v20, %v296_v28 }
 0x2a5   :  { %v297_v31 = vsel %vm293_vm3, %v282_v61, %v290_v48  ;;  %v309_v46 = vsel %vm293_vm3, %v290_v48, %v266_v7  ;;  %v2977_v27 = vpack.c.bf16 %v1863_v29, %v1849_v24 }
 0x2a6   :  { %v338_v56 = vmul.f32 %v1791_v16, %v309_v46  ;;  %v341_v55 = vmul.f32 %v1801_v20, %v297_v31  ;;  %v371_v47 = vpop.permute.xlu0 %370  ;;  %1206 = vmatprep.subr.bf16.mxu0 %v347_v22 }
 0x2a7   :  { %v397_v19 = vsel %vm390_vm4, %v371_v47, %v2396_v11  ;;  %v401_v52 = vsel %vm390_vm4, %v2388_v1, %v371_v47 }
 0x2a8   :  { %v346_v53 = vpack.c.bf16 %v338_v56, %v334_v54  ;;  %v432_v45 = vmul.f32 %v1811_v32, %v401_v52  ;;  %v433_v57 = vmul.f32 %v1819_v8, %v397_v19  ;;  %v373_v28 = vpop.permute.xlu1 %372  ;;  %v349_v7 = vpack.c.bf16 %v341_v55, %v337_v14  ;;  %v2982_v55 = vld [vmem:[#allocation8_spill] sm:$0xff] }
 0x2a9   :  { %v398_v16 = vsel %vm390_vm4, %v373_v28, %v2398_v44  ;;  %v402_v20 = vsel %vm390_vm4, %v2390_v0, %v373_v28  ;;  %v2978_v54 = vpack.c.bf16 %v1905_v36, %v1889_v35  ;;  %v2979_v56 = vpack.c.bf16 %v1902_v33, %v1886_v37 }
 0x2aa   :  { %v436_v22 = vmul.f32 %v1811_v32, %v402_v20  ;;  %v437_v48 = vmul.f32 %v1819_v8, %v398_v16  ;;  %1247 = vmatprep.subr.bf16.mxu1 %v349_v7  ;;  %v387_v51 = vpop.permute.xlu0 %386  ;;  %1207 = vmatpush1.bf16.msra.mxu0 %v346_v53  ;;  %v2983_v28 = vpack.c.bf16 %v1941_v39, %v1925_v40  ;;  %v2984_v16 = vld [vmem:[#allocation9_spill] sm:$0xff] }
 0x2ab   :  { %v393_v4 = vsel %vm390_vm4, %v2396_v11, %v387_v51  ;;  %v405_v61 = vsel %vm390_vm4, %v387_v51, %v2388_v1  ;;  %1208 = vmatprep.subr.bf16.mxu0 %v2977_v27  ;;  %1248 = vmatpush1.bf16.msra.mxu1 %v348_v17 }
 0x2ac   :  { %v445_v31 = vpack.c.bf16 %v437_v48, %v433_v57  ;;  %v431_v32 = vmul.f32 %v1822_v15, %v405_v61  ;;  %v434_v8 = vmul.f32 %v1846_v30, %v393_v4  ;;  %v389_v46 = vpop.permute.xlu1 %388  ;;  %1249 = vmatprep.subr.bf16.mxu1 %v2978_v54  ;;  %v444_v11 = vpack.c.bf16 %v436_v22, %v432_v45  ;;  %v2985_v22 = vld [vmem:[#allocation10_spill] sm:$0xff] }
 0x2ad   :  { %v394_v1 = vsel %vm390_vm4, %v2398_v44, %v389_v46  ;;  %v406_v24 = vsel %vm390_vm4, %v389_v46, %v2390_v0  ;;  %v2980_v44 = vpack.c.bf16 %v1866_v6, %v1852_v2  ;;  %v2986_v4 = vpack.c.bf16 %v1983_v18, %v1967_v34 }
 0x2ae   :  { %v435_v29 = vmul.f32 %v1822_v15, %v406_v24  ;;  %v438_v17 = vmul.f32 %v1846_v30, %v394_v1  ;;  %v468_v14 = vpop.permute.xlu0 %467  ;;  %1209 = vmatpush1.bf16.msra.mxu0 %v2979_v56  ;;  %v2981_v30 = vld [vmem:[#allocation7_spill] sm:$0xff]  ;;  %v2994_v24 = vld [vmem:[#allocation14_spill] sm:$0xff] }
 0x2af   :  { %v494_v35 = vsel %vm487_vm5, %v468_v14, %v2404_v3  ;;  %v498_v36 = vsel %vm487_vm5, %v2400_v21, %v468_v14  ;;  %1210 = vmatprep.subr.bf16.mxu0 %v444_v11  ;;  %1250 = vmatpush1.bf16.msra.mxu1 %v2980_v44  ;;  %v2993_v11 = vld [vmem:[#allocation13_spill] sm:$0xff] }
 0x2b0   :  { %v443_v15 = vpack.c.bf16 %v435_v29, %v431_v32  ;;  %v529_v0 = vmul.f32 %v2981_v30, %v498_v36  ;;  %v530_v47 = vmul.f32 %v2982_v55, %v494_v35  ;;  %v470_v37 = vpop.permute.xlu1 %469  ;;  %v446_v33 = vpack.c.bf16 %v438_v17, %v434_v8  ;;  %v2988_v32 = vld [vmem:[#allocation15_spill] sm:$0xff] }
 0x2b1   :  { %v495_v19 = vsel %vm487_vm5, %v470_v37, %v2406_v25  ;;  %v499_v52 = vsel %vm487_vm5, %v2402_v62, %v470_v37  ;;  %v2996_v37 = vld [vmem:[#allocation17_spill] sm:$0xff] }
 0x2b2   :  { %v533_v53 = vmul.f32 %v2981_v30, %v499_v52  ;;  %v534_v2 = vmul.f32 %v2982_v55, %v495_v19  ;;  %1251 = vmatprep.subr.bf16.mxu1 %v446_v33  ;;  %v484_v6 = vpop.permute.xlu0 %483  ;;  %1211 = vmatpush1.bf16.msra.mxu0 %v443_v15  ;;  %v2995_v55 = vpack.c.bf16 %v2019_v43, %v2003_v41  ;;  %v2997_v19 = vld [vmem:[#allocation18_spill] sm:$0xff] }
 0x2b3   :  { %v490_v45 = vsel %vm487_vm5, %v2404_v3, %v484_v6  ;;  %v502_v57 = vsel %vm487_vm5, %v484_v6, %v2400_v21  ;;  %1212 = vmatprep.subr.bf16.mxu0 %v2983_v28  ;;  %1252 = vmatpush1.bf16.msra.mxu1 %v445_v31  ;;  %v2987_v31 = vld [vmem:[#allocation16_spill] sm:$0xff]  ;;  %v3000_v28 = vld [vmem:[#allocation23_spill] sm:$0xff] }
 0x2b4   :  { %v542_v7 = vpack.c.bf16 %v534_v2, %v530_v47  ;;  %v528_v20 = vmul.f32 %v2984_v16, %v502_v57  ;;  %v531_v48 = vmul.f32 %v2985_v22, %v490_v45  ;;  %v486_v51 = vpop.permute.xlu1 %485  ;;  %1253 = vmatprep.subr.bf16.mxu1 %v2986_v4  ;;  %v541_v3 = vpack.c.bf16 %v533_v53, %v529_v0  ;;  %v2999_v57 = vld [vmem:[#allocation24_spill] sm:$0xff] }
 0x2b5   :  { %v491_v21 = vsel %vm487_vm5, %v2406_v25, %v486_v51  ;;  %v503_v40 = vsel %vm487_vm5, %v486_v51, %v2402_v62  ;;  %v2989_v8 = vpack.c.bf16 %v2987_v31, %v2988_v32  ;;  %v2990_v25 = vld [vmem:[#allocation12_spill] sm:$0xff]  ;;  %v2991_v62 = vld [vmem:[#allocation11_spill] sm:$0xff]  ;;  %v2998_v2 = vpack.c.bf16 %v2061_v5, %v2045_v13  ;;  %v3006_v51 = vld [vmem:[#allocation22_spill] sm:$0xff] }
 0x2b6   :  { %v532_v39 = vmul.f32 %v2984_v16, %v503_v40  ;;  %v535_v61 = vmul.f32 %v2985_v22, %v491_v21  ;;  %v565_v27 = vpop.permute.xlu0 %564  ;;  %v2992_v46 = vpack.c.bf16 %v2990_v25, %v2991_v62  ;;  %v3005_v22 = vld [vmem:[#allocation21_spill] sm:$0xff] }
 0x2b7   :  { %1213 = vmatpush1.bf16.msra.mxu0 %v2989_v8  ;;  %v591_v34 = vsel %vm584_vm6, %v565_v27, %v2412_v23  ;;  %v595_v18 = vsel %vm584_vm6, %v2408_v50, %v565_v27  ;;  %v3008_v25 = vld [vmem:[#allocation25_spill] sm:$0xff] }
 0x2b8   :  { %1214 = vmatprep.subr.bf16.mxu0 %v541_v3  ;;  %1254 = vmatpush1.bf16.msra.mxu1 %v2992_v46  ;;  %v540_v54 = vpack.c.bf16 %v532_v39, %v528_v20  ;;  %v626_v1 = vmul.f32 %v2993_v11, %v595_v18  ;;  %v627_v29 = vmul.f32 %v2994_v24, %v591_v34  ;;  %v567_v17 = vpop.permute.xlu1 %566  ;;  %v3009_v46 = vld [vmem:[#allocation26_spill] sm:$0xff] }
 0x2b9   :  { %v543_v14 = vpack.c.bf16 %v535_v61, %v531_v48  ;;  %v592_v56 = vsel %vm584_vm6, %v567_v17, %v2414_v9  ;;  %v596_v35 = vsel %vm584_vm6, %v2410_v10, %v567_v17  ;;  %v3007_v34 = vpack.c.bf16 %v2100_v49, %v2084_v38  ;;  %v3011_v17 = vld [vmem:[#allocation28_spill] sm:$0xff] }
 0x2ba   :  { %v630_v36 = vmul.f32 %v2993_v11, %v596_v35  ;;  %v631_v44 = vmul.f32 %v2994_v24, %v592_v56  ;;  %v581_v15 = vpop.permute.xlu0 %580  ;;  %v3015_v35 = vld [vmem:[#allocation68_spill] sm:$0xff] }
 0x2bb   :  { %1255 = vmatprep.subr.bf16.mxu1 %v543_v14  ;;  %1215 = vmatpush1.bf16.msra.mxu0 %v540_v54  ;;  %v587_v30 = vsel %vm584_vm6, %v2412_v23, %v581_v15  ;;  %v599_v0 = vsel %vm584_vm6, %v581_v15, %v2408_v50  ;;  %v3012_v14 = vld [vmem:[#allocation27_spill] sm:$0xff] }
 0x2bc   :  { %1216 = vmatprep.subr.bf16.mxu0 %v2995_v55  ;;  %1256 = vmatpush1.bf16.msra.mxu1 %v542_v7  ;;  %v639_v47 = vpack.c.bf16 %v631_v44, %v627_v29  ;;  %v625_v33 = vmul.f32 %v2996_v37, %v599_v0  ;;  %v628_v52 = vmul.f32 %v2997_v19, %v587_v30  ;;  %v583_v53 = vpop.permute.xlu1 %582  ;;  %v3019_v30 = vld [vmem:[#allocation29_spill] sm:$0xff]  ;;  %v3020_v55 = vld [vmem:[#allocation30_spill] sm:$0xff] }
 0x2bd   :  { %1257 = vmatprep.subr.bf16.mxu1 %v2998_v2  ;;  %v638_v23 = vpack.c.bf16 %v630_v36, %v626_v1  ;;  %v588_v50 = vsel %vm584_vm6, %v2414_v9, %v583_v53  ;;  %v600_v41 = vsel %vm584_vm6, %v583_v53, %v2410_v10  ;;  %v3001_v7 = vpack.c.bf16 %v2999_v57, %v3000_v28  ;;  %v3002_v9 = vld [vmem:[#allocation20_spill] sm:$0xff]  ;;  %v3003_v10 = vld [vmem:[#allocation19_spill] sm:$0xff]  ;;  %v3022_v53 = vld [vmem:[#allocation69_spill] sm:$0xff] }
 0x2be   :  { %v629_v43 = vmul.f32 %v2996_v37, %v600_v41  ;;  %v632_v6 = vmul.f32 %v2997_v19, %v588_v50  ;;  %v662_v45 = vpop.permute.xlu0 %661  ;;  %v3004_v16 = vpack.c.bf16 %v3002_v9, %v3003_v10  ;;  %v3010_v1 = vpack.c.bf16 %v2139_v42, %v2123_v12  ;;  %v3014_v12 = vld [vmem:[#allocation70_spill] sm:$0xff]  ;;  %v3016_v36 = vld [vmem:[#allocation32_spill] sm:$0xff]  ;;  %v3021_v19 = vld [vmem:[#allocation71_spill] sm:$0xff] }
 0x2bf   :  { %1217 = vmatpush1.bf16.msra.mxu0 %v3001_v7  ;;  %v688_v13 = vsel %vm681_vm7, %v662_v45, %v2420_v59  ;;  %v692_v5 = vsel %vm681_vm7, %v2416_v26, %v662_v45  ;;  %v3013_v56 = vpack.c.bf16 %v3011_v17, %v3012_v14  ;;  %v3023_v45 = vld [vmem:[#allocation38_spill] sm:$0xff]  ;;  %v3024_v57 = vld [vmem:[#allocation36_spill] sm:$0xff]  ;;  %v3042_v17 = vld [vmem:[#allocation73_spill] sm:$0xff] }
 0x2c0   :  { %1218 = vmatprep.subr.bf16.mxu0 %v638_v23  ;;  %1258 = vmatpush1.bf16.msra.mxu1 %v3004_v16  ;;  %v637_v20 = vpack.c.bf16 %v629_v43, %v625_v33  ;;  %v722_v48 = vmul.f32 %v3005_v22, %v692_v5  ;;  %v723_v4 = vmul.f32 %v3006_v51, %v688_v13  ;;  %v664_v3 = vpop.permute.xlu1 %663  ;;  %v3026_v13 = vld [vmem:[#allocation33_spill] sm:$0xff]  ;;  %v3027_v9 = vld [vmem:[#allocation34_spill] sm:$0xff] }
 0x2c1   :  { %v640_v21 = vpack.c.bf16 %v632_v6, %v628_v52  ;;  %v689_v40 = vsel %vm681_vm7, %v664_v3, %v2422_v58  ;;  %v693_v39 = vsel %vm681_vm7, %v2418_v60, %v664_v3  ;;  %v3025_v28 = vpack.c.bf16 %v3023_v45, %v3024_v57  ;;  %v3052_v45 = vld [vmem:[#allocation47_spill] sm:$0xff] }
 0x2c2   :  { %v726_v61 = vmul.f32 %v3005_v22, %v693_v39  ;;  %v727_v27 = vmul.f32 %v3006_v51, %v689_v40  ;;  %v678_v31 = vpop.permute.xlu0 %677  ;;  %v3029_v22 = vld [vmem:[#allocation42_spill] sm:$0xff] }
 0x2c3   :  { %1259 = vmatprep.subr.bf16.mxu1 %v640_v21  ;;  %1219 = vmatpush1.bf16.msra.mxu0 %v637_v20  ;;  %v684_v32 = vsel %vm681_vm7, %v2420_v59, %v678_v31  ;;  %v696_v8 = vsel %vm681_vm7, %v678_v31, %v2416_v26  ;;  %v3028_v20 = vld [vmem:[#allocation44_spill] sm:$0xff] }
 0x2c4   :  { %1220 = vmatprep.subr.bf16.mxu0 %v3007_v34  ;;  %1260 = vmatpush1.bf16.msra.mxu1 %v639_v47  ;;  %v734_v18 = vpack.c.bf16 %v726_v61, %v722_v48  ;;  %v724_v62 = vmul.f32 %v3008_v25, %v684_v32  ;;  %v725_v54 = vmul.f32 %v3009_v46, %v696_v8  ;;  %v680_v11 = vpop.permute.xlu1 %679  ;;  %v3031_v61 = vld [vmem:[#allocation37_spill] sm:$0xff]  ;;  %v3034_v32 = vld [vmem:[#allocation74_spill] sm:$0xff]  ;;  %v3035_v34 = vld [vmem:[#allocation72_spill] sm:$0xff] }
 0x2c5   :  { %1261 = vmatprep.subr.bf16.mxu1 %v3010_v1  ;;  %v735_v59 = vpack.c.bf16 %v727_v27, %v723_v4  ;;  %v685_v26 = vsel %vm681_vm7, %v2422_v58, %v680_v11  ;;  %v697_v38 = vsel %vm681_vm7, %v680_v11, %v2418_v60  ;;  %v3017_v60 = vld [vmem:[#allocation31_spill] sm:$0xff]  ;;  %v3030_v48 = vpack.c.bf16 %v3028_v20, %v3029_v22 }
 0x2c6   :  { %v728_v49 = vmul.f32 %v3008_v25, %v685_v26  ;;  %v729_v24 = vmul.f32 %v3009_v46, %v697_v38  ;;  %v759_v29 = vpop.permute.xlu0 %758  ;;  %v3018_v44 = vpack.c.bf16 %v3016_v36, %v3017_v60  ;;  %v3032_v27 = vld [vmem:[#allocation35_spill] sm:$0xff]  ;;  %v3043_v36 = vld [vmem:[#allocation50_spill] sm:$0xff]  ;;  %v3044_v60 = vld [vmem:[#allocation48_spill] sm:$0xff] }
 0x2c7   :  { %1221 = vmatpush1.bf16.msra.mxu0 %v3013_v56  ;;  %v785_v42 = vsel %vm778_vm8, %v759_v29, %v3014_v12  ;;  %v789_v58 = vsel %vm778_vm8, %v3015_v35, %v759_v29  ;;  %v3033_v31 = vpack.c.bf16 %v3031_v61, %v3032_v27  ;;  %v3036_v25 = vld [vmem:[#allocation43_spill] sm:$0xff]  ;;  %v3062_v61 = vld [vmem:[#allocation77_spill] sm:$0xff] }
 0x2c8   :  { %1222 = vmatprep.subr.bf16.mxu0 %v735_v59  ;;  %1262 = vmatpush1.bf16.msra.mxu1 %v3018_v44  ;;  %v736_v15 = vpack.c.bf16 %v728_v49, %v724_v62  ;;  %v819_v0 = vmul.f32 %v3019_v30, %v789_v58  ;;  %v820_v47 = vmul.f32 %v3020_v55, %v785_v42  ;;  %v761_v37 = vpop.permute.xlu1 %760  ;;  %v3037_v62 = vld [vmem:[#allocation41_spill] sm:$0xff]  ;;  %v3039_v11 = vld [vmem:[#allocation39_spill] sm:$0xff]  ;;  %v3040_v59 = vld [vmem:[#allocation40_spill] sm:$0xff] }
 0x2c9   :  { %v737_v33 = vpack.c.bf16 %v729_v24, %v725_v54  ;;  %v786_v52 = vsel %vm778_vm8, %v761_v37, %v3021_v19  ;;  %v790_v2 = vsel %vm778_vm8, %v3022_v53, %v761_v37  ;;  %v3038_v46 = vpack.c.bf16 %v3036_v25, %v3037_v62  ;;  %v3041_v24 = vld [vmem:[#allocation75_spill] sm:$0xff]  ;;  %v3063_v25 = vld [vmem:[#allocation62_spill] sm:$0xff]  ;;  %v3064_v62 = vld [vmem:[#allocation60_spill] sm:$0xff] }
 0x2ca   :  { %v823_v23 = vmul.f32 %v3019_v30, %v790_v2  ;;  %v824_v50 = vmul.f32 %v3020_v55, %v786_v52  ;;  %v775_v41 = vpop.permute.xlu0 %774  ;;  %v3045_v44 = vpack.c.bf16 %v3043_v36, %v3044_v60  ;;  %v3046_v30 = vld [vmem:[#allocation45_spill] sm:$0xff]  ;;  %v3047_v55 = vld [vmem:[#allocation46_spill] sm:$0xff]  ;;  %v3059_v22 = vld [vmem:[#allocation51_spill] sm:$0xff] }
 0x2cb   :  { %1263 = vmatprep.subr.bf16.mxu1 %v737_v33  ;;  %1223 = vmatpush1.bf16.msra.mxu0 %v734_v18  ;;  %v781_v43 = vsel %vm778_vm8, %v3014_v12, %v775_v41  ;;  %v793_v6 = vsel %vm778_vm8, %v775_v41, %v3015_v35  ;;  %v3048_v33 = vld [vmem:[#allocation56_spill] sm:$0xff]  ;;  %v3074_v60 = vld [vmem:[#allocation65_spill] sm:$0xff] }
 0x2cc   :  { %1224 = vmatprep.subr.bf16.mxu0 %v3025_v28  ;;  %1264 = vmatpush1.bf16.msra.mxu1 %v736_v15  ;;  %v831_v7 = vpack.c.bf16 %v823_v23, %v819_v0  ;;  %v821_v5 = vmul.f32 %v3026_v13, %v781_v43  ;;  %v822_v10 = vmul.f32 %v3027_v9, %v793_v6  ;;  %v777_v16 = vpop.permute.xlu1 %776  ;;  %v3051_v6 = vld [vmem:[#allocation49_spill] sm:$0xff]  ;;  %v3054_v28 = vld [vmem:[#allocation78_spill] sm:$0xff] }
 0x2cd   :  { %1265 = vmatprep.subr.bf16.mxu1 %v3030_v48  ;;  %v832_v51 = vpack.c.bf16 %v824_v50, %v820_v47  ;;  %v782_v4 = vsel %vm778_vm8, %v3021_v19, %v777_v16  ;;  %v794_v3 = vsel %vm778_vm8, %v777_v16, %v3022_v53  ;;  %v3049_v19 = vld [vmem:[#allocation54_spill] sm:$0xff]  ;;  %v3053_v57 = vpack.c.bf16 %v3051_v6, %v3052_v45 }
 0x2ce   :  { %v825_v21 = vmul.f32 %v3026_v13, %v782_v4  ;;  %v826_v40 = vmul.f32 %v3027_v9, %v794_v3  ;;  %v856_v39 = vpop.permute.xlu0 %855  ;;  %v3050_v52 = vpack.c.bf16 %v3048_v33, %v3049_v19  ;;  %v3055_v13 = vld [vmem:[#allocation76_spill] sm:$0xff]  ;;  %v3056_v9 = vld [vmem:[#allocation55_spill] sm:$0xff] }
 0x2cf   :  { %1225 = vmatpush1.bf16.msra.mxu0 %v3033_v31  ;;  %v882_v8 = vsel %vm875_vm9, %v856_v39, %v3034_v32  ;;  %v886_v18 = vsel %vm875_vm9, %v3035_v34, %v856_v39 }
 0x2d0   :  { %1226 = vmatprep.subr.bf16.mxu0 %v832_v51  ;;  %1266 = vmatpush1.bf16.msra.mxu1 %v3038_v46  ;;  %v833_v54 = vpack.c.bf16 %v825_v21, %v821_v5  ;;  %v916_v1 = vmul.f32 %v3039_v11, %v886_v18  ;;  %v917_v26 = vmul.f32 %v3040_v59, %v882_v8  ;;  %v858_v38 = vpop.permute.xlu1 %857  ;;  %v3060_v51 = vld [vmem:[#allocation52_spill] sm:$0xff] }
 0x2d1   :  { %v834_v49 = vpack.c.bf16 %v826_v40, %v822_v10  ;;  %v883_v29 = vsel %vm875_vm9, %v858_v38, %v3041_v24  ;;  %v887_v14 = vsel %vm875_vm9, %v3042_v17, %v858_v38  ;;  %v3057_v10 = vld [vmem:[#allocation53_spill] sm:$0xff]  ;;  %v3061_v40 = vld [vmem:[#allocation79_spill] sm:$0xff]  ;;  %v3065_v46 = vpack.c.bf16 %v3063_v25, %v3064_v62 }
 0x2d2   :  { %v920_v56 = vmul.f32 %v3039_v11, %v887_v14  ;;  %v921_v12 = vmul.f32 %v3040_v59, %v883_v29  ;;  %v872_v42 = vpop.permute.xlu0 %871  ;;  %v3058_v16 = vpack.c.bf16 %v3056_v9, %v3057_v10  ;;  %v3066_v11 = vld [vmem:[#allocation57_spill] sm:$0xff]  ;;  %v3067_v59 = vld [vmem:[#allocation58_spill] sm:$0xff] }
 0x2d3   :  { %1267 = vmatprep.subr.bf16.mxu1 %v834_v49  ;;  %1227 = vmatpush1.bf16.msra.mxu0 %v831_v7  ;;  %v878_v35 = vsel %vm875_vm9, %v3034_v32, %v872_v42  ;;  %v890_v58 = vsel %vm875_vm9, %v872_v42, %v3035_v34  ;;  %v3068_v49 = vld [vmem:[#allocation66_spill] sm:$0xff] }
 0x2d4   :  { %1228 = vmatprep.subr.bf16.mxu0 %v3045_v44  ;;  %1268 = vmatpush1.bf16.msra.mxu1 %v833_v54  ;;  %v928_v15 = vpack.c.bf16 %v920_v56, %v916_v1  ;;  %v918_v0 = vmul.f32 %v3046_v30, %v878_v35  ;;  %v919_v47 = vmul.f32 %v3047_v55, %v890_v58  ;;  %v874_v37 = vpop.permute.xlu1 %873  ;;  %v3071_v35 = vld [vmem:[#allocation61_spill] sm:$0xff]  ;;  %v3072_v58 = vld [vmem:[#allocation59_spill] sm:$0xff] }
 0x2d5   :  { %1269 = vmatprep.subr.bf16.mxu1 %v3050_v52  ;;  %v929_v53 = vpack.c.bf16 %v921_v12, %v917_v26  ;;  %v879_v2 = vsel %vm875_vm9, %v3041_v24, %v874_v37  ;;  %v891_v23 = vsel %vm875_vm9, %v874_v37, %v3042_v17  ;;  %v3069_v24 = vld [vmem:[#allocation64_spill] sm:$0xff]  ;;  %v3073_v36 = vpack.c.bf16 %v3071_v35, %v3072_v58  ;;  %v3075_v44 = vld [vmem:[#allocation63_spill] sm:$0xff] }
 0x2d6   :  { %v922_v50 = vmul.f32 %v3046_v30, %v879_v2  ;;  %v923_v41 = vmul.f32 %v3047_v55, %v891_v23  ;;  %v953_v43 = vpop.permute.xlu0 %952  ;;  %v3070_v29 = vpack.c.bf16 %v3068_v49, %v3069_v24  ;;  %v3077_v55 = vld [vmem:[#allocation67_spill] sm:$0xff] }
 0x2d7   :  { %1229 = vmatpush1.bf16.msra.mxu0 %v3053_v57  ;;  %v979_v7 = vsel %vm972_vm10, %v953_v43, %v3054_v28  ;;  %v983_v5 = vsel %vm972_vm10, %v3055_v13, %v953_v43 }
 0x2d8   :  { %1230 = vmatprep.subr.bf16.mxu0 %v929_v53  ;;  %1270 = vmatpush1.bf16.msra.mxu1 %v3058_v16  ;;  %v930_v20 = vpack.c.bf16 %v922_v50, %v918_v0  ;;  %v1013_v48 = vmul.f32 %v3059_v22, %v983_v5  ;;  %v1014_v4 = vmul.f32 %v3060_v51, %v979_v7  ;;  %v955_v3 = vpop.permute.xlu1 %954 }
 0x2d9   :  { %v931_v21 = vpack.c.bf16 %v923_v41, %v919_v47  ;;  %v980_v39 = vsel %vm972_vm10, %v955_v3, %v3061_v40  ;;  %v984_v27 = vsel %vm972_vm10, %v3062_v61, %v955_v3  ;;  %v1314_v47 = vcombine.low %v3077_v55, %v3077_v55 }
 0x2da   :  { %v1017_v31 = vmul.f32 %v3059_v22, %v984_v27  ;;  %v1018_v32 = vmul.f32 %v3060_v51, %v980_v39  ;;  %v969_v8 = vpop.permute.xlu0 %968 }
 0x2db   :  { %1271 = vmatprep.subr.bf16.mxu1 %v931_v21  ;;  %1231 = vmatpush1.bf16.msra.mxu0 %v928_v15  ;;  %v975_v34 = vsel %vm972_vm10, %v3054_v28, %v969_v8  ;;  %v987_v18 = vsel %vm972_vm10, %v969_v8, %v3055_v13  ;;  %v3076_v15 = vpack.c.bf16 %v3074_v60, %v3075_v44 }
 0x2dc   :  { %1232 = vmatprep.subr.bf16.mxu0 %v3065_v46  ;;  %1272 = vmatpush1.bf16.msra.mxu1 %v930_v20  ;;  %v1025_v54 = vpack.c.bf16 %v1017_v31, %v1013_v48  ;;  %v1015_v1 = vmul.f32 %v3066_v11, %v975_v34  ;;  %v1016_v26 = vmul.f32 %v3067_v59, %v987_v18  ;;  %v971_v38 = vpop.permute.xlu1 %970 }
 0x2dd   :  { %1273 = vmatprep.subr.bf16.mxu1 %v3070_v29  ;;  %v1026_v17 = vpack.c.bf16 %v1018_v32, %v1014_v4  ;;  %v976_v14 = vsel %vm972_vm10, %v3061_v40, %v971_v38  ;;  %v988_v56 = vsel %vm972_vm10, %v971_v38, %v3062_v61 }
 0x2de   :  { %v1019_v12 = vmul.f32 %v3066_v11, %v976_v14  ;;  %v1020_v42 = vmul.f32 %v3067_v59, %v988_v56 }
 0x2df   :  { %1233 = vmatpush1.bf16.msra.mxu0 %v3073_v36 }
 0x2e0   :  { %1234 = vmatprep.subr.bf16.mxu0 %v1026_v17  ;;  %1274 = vmatpush1.bf16.msra.mxu1 %v3076_v15  ;;  %v1027_v30 = vpack.c.bf16 %v1019_v12, %v1015_v1  ;;  %v1028_v0 = vpack.c.bf16 %v1020_v42, %v1016_v26 }
 0x2e2   :  { %1275 = vmatprep.subr.bf16.mxu1 %v1028_v0 }
 0x2e3   :  { %1235 = vmatpush1.bf16.msra.mxu0 %v1025_v54 }
 0x2e4   :  { %1276 = vmatpush1.bf16.msra.mxu1 %v1027_v30 }
 0x2e6   :  { %1237 = vmatmul.mubr.bf16.vlgmr.msra.gmra.mrb[8].mxu0 %v1314_v47 }
 0x2e7   :  { %1278 = vmatmul.mubr.bf16.vlgmr.msra.gmra.mrb[8].mxu1 %v1314_v47 }
 0x3b9   :  { %v1238_v63 = vpop.f32.mrb[8].mxu0 }
 0x3ba   :  { %1286 = vst [vmem:[#allocation3] sm:$0xff] %v1238_v63  ;;  %v1240_v37 = vpop.f32.mrb[9].mxu0  ;;  %v1279_v33 = vpop.f32.mrb[8].mxu1 }
 0x3bb   :  { %1287 = vst [vmem:[#allocation3 + $0x8] sm:$0xff] %v1240_v37  ;;  %1288 = vst [vmem:[#allocation3 + $0x10] sm:$0xff] %v1279_v33  ;;  %v1242_v19 = vpop.f32.mrb[10].mxu0  ;;  %v1281_v52 = vpop.f32.mrb[9].mxu1 }
 0x3bc   :  { %1289 = vst [vmem:[#allocation3 + $0x18] sm:$0xff] %v1281_v52  ;;  %v1243_v53 = vpop.f32.mrb[11].mxu0  ;;  %v1283_v2 = vpop.f32.mrb[10].mxu1 }
 0x3bd   :  { %v1284_v23 = vpop.f32.mrb[11].mxu1 }
 0x3be   :  { %1352 = shalt.err (!%p1349_p4)
}
 0x3bf   :  { %s1353_s18 = scalar_lea.hbm %s2802_s8, 512 }
 0x3c0   :  { %p1354_p5 = scmp.ne.s32.totalorder %s2802_s8, %s1353_s18  ;;  %p1357_p6 = scmp.lt.u32.totalorder %s1353_s18, %s2802_s8 }
 0x3c2   :  { %p1359_p7 = pnand %p1357_p6, %p1354_p5 }
 0x3c4   :  { %1362 = shalt.err (!%p1359_p7)
}
 0x3c5   :  { %1299 = dma.vmem_to_hbm [thread:$0]  %s1297_s2, 512, %s2802_s8, [#allocation4]  }
 0x3c6   :  { %1363 = dma.done.wait [#allocation4], 512  }
 0x3c7   :  { %1364 = vsyncadd [#allocation4], 4294966784 }
 0x3c8   :  { %1303 = vsyncpa [#allocation4], 1 }

</bundles_post_ra>
